<compile_context>
chip_gen: v6e
topology: v6e:2x2x1
jax: 0.10.0
libtpu: 0.0.40
codegen_flags: <defaults>
</compile_context>

<pallas_src>
import functools

import jax
import jax.numpy as jnp
from jax import lax
from jax.experimental import pallas as pl
from jax.experimental.pallas import tpu as pltpu

EPS = 1e-5          # PyTorch GroupNorm default eps
_SUBLANE = 8        # f32 sublane quantum
_BF16_MIN_C = 64    # only use bf16 MXU operands when the conv is big enough to matter


def _round_up(x, m):
    return (x + m - 1) // m * m


def _lane_coords(HW, H, W):
    """(y, x) spatial coordinates for each lane of a per-sample (.., H*W) row."""
    p = lax.broadcasted_iota(jnp.int32, (1, HW), 1)
    if (W & (W - 1)) == 0:
        yy = jnp.right_shift(p, W.bit_length() - 1)   # p // W (W power of two)
        xx = jnp.bitwise_and(p, W - 1)                # p %  W
    else:
        yy = p // W
        xx = p % W
    return yy, xx


def resblock_kernel(x_ref, w1_ref, g1w_ref, g1b_ref, w2_ref, g2w_ref, g2b_ref,
                    out_ref, *, H, W, C, C_pad, G, nb, use_bf16):
    HW = H * W
    gs = C // G
    inv_cnt = 1.0 / float(gs * HW)

    # ---- hoisted, sample-invariant values ---------------------------------
    w1 = w1_ref[...]
    w2 = w2_ref[...]
    g1w = g1w_ref[...]
    g1b = g1b_ref[...]
    g2w = g2w_ref[...]
    g2b = g2b_ref[...]

    yy, xx = _lane_coords(HW, H, W)
    shifts, masks = [], []
    for dy in (-1, 0, 1):
        for dx in (-1, 0, 1):
            shifts.append(dy * W + dx)
            conds = []
            if dy < 0:
                conds.append(yy >= -dy)
            if dy > 0:
                conds.append(yy < H - dy)
            if dx < 0:
                conds.append(xx >= -dx)
            if dx > 0:
                conds.append(xx < W - dx)
            m = None
            for c in conds:
                m = c if m is None else (m & c)
            masks.append(m)

    zpad = jnp.zeros((C_pad - C, HW), jnp.float32) if C_pad > C else None

    if gs > 1:
        # Contiguous same-group indicator, restricted to real channels.  Only
        # needed for C > 32 (G = min(32, C)); built exactly once per body.
        ci = lax.broadcasted_iota(jnp.int32, (C_pad, C_pad), 0)
        cj = lax.broadcasted_iota(jnp.int32, (C_pad, C_pad), 1)
        S = ((ci // gs == cj // gs) & (ci < C) & (cj < C)).astype(jnp.float32)
    else:
        S = None

    def conv3x3(v, w):
        # im2col: one (C_pad, 9*C_pad) @ (9*C_pad, HW) MXU matmul.  Each tap is
        # an XLU lane-rotate (pltpu.roll follows jnp.roll, so shift = -s gives
        # piece[p] = v[p + s]); zero padding handled by the boundary masks.
        pieces = []
        for s, m in zip(shifts, masks):
            sh = v if s == 0 else pltpu.roll(v, shift=(-s) % HW, axis=1)
            pieces.append(sh if m is None else jnp.where(m, sh, 0.0))
        patches = jnp.concatenate(pieces, axis=0)          # (9*C_pad, HW), 8-aligned
        if use_bf16:
            patches = patches.astype(jnp.bfloat16)
        return jnp.dot(w, patches, preferred_element_type=jnp.float32)

    def gn_relu(v, gamma, beta):
        s1 = jnp.sum(v, axis=1, keepdims=True)             # (C_pad, 1)
        s2 = jnp.sum(v * v, axis=1, keepdims=True)         # (C_pad, 1)
        if S is not None:
            agg = jnp.dot(S, jnp.concatenate([s1, s2], axis=1),
                          preferred_element_type=jnp.float32)
            s1 = agg[:, 0:1]
            s2 = agg[:, 1:2]
        mean = s1 * inv_cnt
        # clamp: E[x^2] - E[x]^2 can cancel to a tiny negative
        var = jnp.maximum(s2 * inv_cnt - mean * mean, 0.0)
        inv = lax.rsqrt(var + EPS)
        return jnp.maximum((v - mean) * inv * gamma + beta, 0.0)

    def process_sample(n):
        x_n = x_ref[n].astype(jnp.float32)                 # (C, HW), lane-dense
        xp = x_n if zpad is None else jnp.concatenate([x_n, zpad], axis=0)
        y = gn_relu(conv3x3(xp, w1), g1w, g1b)             # conv1 -> GN1 -> ReLU
        z = gn_relu(conv3x3(y, w2), g2w, g2b)              # conv2 -> GN2 -> ReLU
        # fused residual + per-sample lane-dense store (no full-tile concat)
        out_ref[n] = (z[:C, :] + x_n).astype(out_ref.dtype)

    if nb <= 8:
        for n in range(nb):       # static unroll: LLO scheduler visibility
            process_sample(n)
    else:
        @pl.loop(0, nb)
        def _(n):
            process_sample(n)


def _pick_samples_per_block(N, C_pad, HW, two_cores):
    """Generation-aware block sizing.

    Single-TC parts (v5e/v6e): one big grid step (per-step overhead ~0.35us is
    pure serialization there).  Two-TC parts (v7x): keep an even number (>= 2)
    of grid steps so both TensorCores get work, budgeted against the smaller
    VMEM."""
    budget = (16 if two_cores else 48) * 1024 * 1024
    per_sample_io = C_pad * HW * 4 * 2 * 2        # x + out, double-buffered, f32
    per_sample_work = 32 * C_pad * HW * 4         # pieces/patches/acts live set
    max_nb = max(1, (budget - per_sample_work) // per_sample_io)
    divs = [d for d in range(1, N + 1) if N % d == 0 and d <= max_nb] or [1]
    if two_cores:
        even = [d for d in divs if N // d >= 2 and (N // d) % 2 == 0]
        if even:
            return max(even)
        multi = [d for d in divs if N // d >= 2]
        if multi:
            return max(multi)
    return max(divs)


def resblock_forward(x_nchw, w1_oihw, g1w, g1b, w2_oihw, g2w, g2b, groups):
    N, C, H, W = x_nchw.shape
    HW = H * W
    C_pad = _round_up(C, _SUBLANE)
    use_bf16 = C >= _BF16_MIN_C

    kind = ""
    try:
        kind = jax.devices()[0].device_kind.lower()
    except Exception:
        pass
    two_cores = ("v7" in kind) or ("7x" in kind)
    nb = _pick_samples_per_block(N, C_pad, HW, two_cores)

    # Activations keep their natural layout: (N, C, H, W) -> (N, C, H*W) is a
    # contiguous no-op reshape, so there is NO wrapper-side HBM transpose on
    # either side of the kernel.
    x3 = x_nchw.reshape(N, C, HW)

    w_dtype = jnp.bfloat16 if use_bf16 else jnp.float32

    def flat_w(w):
        # OIHW -> (C_pad, 9*C_pad): tap-major, input-channel-minor, zero-padded
        # to the sublane quantum (pad rows/cols are zero => pad channels stay 0).
        w = jnp.transpose(w, (0, 2, 3, 1))                     # (O, KH, KW, I)
        w = jnp.pad(w, ((0, C_pad - C), (0, 0), (0, 0), (0, C_pad - C)))
        return w.reshape(C_pad, 9 * C_pad).astype(w_dtype)

    def col(v):
        return jnp.pad(v.astype(jnp.float32).reshape(C, 1), ((0, C_pad - C), (0, 0)))

    kernel = functools.partial(resblock_kernel, H=H, W=W, C=C, C_pad=C_pad,
                               G=groups, nb=nb, use_bf16=use_bf16)

    out3 = pl.pallas_call(
        kernel,
        out_shape=jax.ShapeDtypeStruct((N, C, HW), x_nchw.dtype),
        grid_spec=pltpu.PrefetchScalarGridSpec(
            num_scalar_prefetch=0,
            grid=(N // nb,),
            in_specs=[
                pl.BlockSpec((nb, C, HW), lambda i: (i, 0, 0)),      # x (per-sample lane-dense)
                pl.BlockSpec((C_pad, 9 * C_pad), lambda i: (0, 0)),  # conv1 weight (im2col)
                pl.BlockSpec((C_pad, 1), lambda i: (0, 0)),          # gn1 gamma
                pl.BlockSpec((C_pad, 1), lambda i: (0, 0)),          # gn1 beta
                pl.BlockSpec((C_pad, 9 * C_pad), lambda i: (0, 0)),  # conv2 weight (im2col)
                pl.BlockSpec((C_pad, 1), lambda i: (0, 0)),          # gn2 gamma
                pl.BlockSpec((C_pad, 1), lambda i: (0, 0)),          # gn2 beta
            ],
            out_specs=pl.BlockSpec((nb, C, HW), lambda i: (i, 0, 0)),
        ),
        compiler_params=pltpu.CompilerParams(
            dimension_semantics=("parallel",),
            vmem_limit_bytes=(24 if two_cores else 64) * 1024 * 1024,
        ),
    )(x3, flat_w(w1_oihw), col(g1w), col(g1b), flat_w(w2_oihw), col(g2w), col(g2b))

    return out3.reshape(N, C, H, W)


# ---------------- pure-JAX reference (verification only) ----------------
def ref_forward(x, w1, g1w, g1b, w2, g2w, g2b, G):
    def conv(x, w):
        return lax.conv_general_dilated(
            x, w, window_strides=(1, 1), padding="SAME",
            dimension_numbers=("NCHW", "OIHW", "NCHW"))

    def gn(x, gamma, beta):
        N, C, H, W = x.shape
        xg = x.reshape(N, G, C // G, H, W)
        mean = xg.mean(axis=(2, 3, 4), keepdims=True)
        var = xg.var(axis=(2, 3, 4), keepdims=True)
        xhat = ((xg - mean) / jnp.sqrt(var + EPS)).reshape(N, C, H, W)
        return xhat * gamma.reshape(1, C, 1, 1) + beta.reshape(1, C, 1, 1)

    out = conv(x, w1)
    out = jnp.maximum(gn(out, g1w, g1b), 0.0)
    out = conv(out, w2)
    out = jnp.maximum(gn(out, g2w, g2b), 0.0)
    return out + x


if __name__ == "__main__":
    N, C, H, W = 2, 4, 16, 16          # in_planes == planes == 4, stride == 1
    G = min(32, C)                     # norm(dim) = GroupNorm(min(32, dim), dim)

    key = jax.random.PRNGKey(0)
    ks = jax.random.split(key, 7)
    x = jax.random.normal(ks[0], (N, C, H, W), jnp.float32)
    w1 = jax.random.normal(ks[1], (C, C, 3, 3), jnp.float32) * 0.2   # conv1.weight (OIHW)
    w2 = jax.random.normal(ks[2], (C, C, 3, 3), jnp.float32) * 0.2   # conv2.weight (OIHW)
    g1w = 1.0 + 0.1 * jax.random.normal(ks[3], (C,), jnp.float32)    # norm1.weight
    g1b = 0.1 * jax.random.normal(ks[4], (C,), jnp.float32)          # norm1.bias
    g2w = 1.0 + 0.1 * jax.random.normal(ks[5], (C,), jnp.float32)    # norm2.weight
    g2b = 0.1 * jax.random.normal(ks[6], (C,), jnp.float32)          # norm2.bias

    out = resblock_forward(x, w1, g1w, g1b, w2, g2w, g2b, G)
    out = jax.block_until_ready(out)

    ref = ref_forward(x, w1, g1w, g1b, w2, g2w, g2b, G)
    err = float(jnp.max(jnp.abs(out - ref)))
    # Small-C path runs f32 MXU operands; tolerance kept loose enough to also
    # cover the bf16-gated large-C configuration.
    assert jnp.allclose(out, ref, atol=5e-2, rtol=5e-2), f"max abs err {err}"

    print("KERNEL_OK")
</pallas_src>

<mosaic_0001>
module attributes {stable_mosaic.version = 11 : i64} {
  func.func @resblock_kernel(%arg0: i32, %arg1: memref<2x4x256xf32, #tpu.memory_space<vmem>>, %arg2: memref<8x72xf32, #tpu.memory_space<vmem>>, %arg3: memref<8x1xf32, #tpu.memory_space<vmem>>, %arg4: memref<8x1xf32, #tpu.memory_space<vmem>>, %arg5: memref<8x72xf32, #tpu.memory_space<vmem>>, %arg6: memref<8x1xf32, #tpu.memory_space<vmem>>, %arg7: memref<8x1xf32, #tpu.memory_space<vmem>>, %arg8: memref<2x4x256xf32, #tpu.memory_space<vmem>>) attributes {dimension_semantics = [#tpu.dimension_semantics<parallel>], iteration_bounds = array<i64: 1>, scalar_prefetch = 0 : i64, scratch_operands = 0 : i64, tpu.core_type = #tpu.core_type<tc>, window_params = [{transform_indices = @transform_0, window_bounds = array<i64: 2, 4, 256>}, {pipeline_mode = #tpu.pipeline_mode<synchronous>, transform_indices = @transform_1, window_bounds = array<i64: 8, 72>}, {pipeline_mode = #tpu.pipeline_mode<synchronous>, transform_indices = @transform_2, window_bounds = array<i64: 8, 1>}, {pipeline_mode = #tpu.pipeline_mode<synchronous>, transform_indices = @transform_3, window_bounds = array<i64: 8, 1>}, {pipeline_mode = #tpu.pipeline_mode<synchronous>, transform_indices = @transform_4, window_bounds = array<i64: 8, 72>}, {pipeline_mode = #tpu.pipeline_mode<synchronous>, transform_indices = @transform_5, window_bounds = array<i64: 8, 1>}, {pipeline_mode = #tpu.pipeline_mode<synchronous>, transform_indices = @transform_6, window_bounds = array<i64: 8, 1>}, {transform_indices = @transform_7, window_bounds = array<i64: 2, 4, 256>}]} {
    %c0 = arith.constant 0 : index
    %c0_0 = arith.constant 0 : index
    %0 = vector.load %arg2[%c0, %c0_0] : memref<8x72xf32, #tpu.memory_space<vmem>>, vector<8x72xf32>
    %c0_1 = arith.constant 0 : index
    %c0_2 = arith.constant 0 : index
    %1 = vector.load %arg5[%c0_1, %c0_2] : memref<8x72xf32, #tpu.memory_space<vmem>>, vector<8x72xf32>
    %c0_3 = arith.constant 0 : index
    %c0_4 = arith.constant 0 : index
    %2 = vector.load %arg3[%c0_3, %c0_4] : memref<8x1xf32, #tpu.memory_space<vmem>>, vector<8x1xf32>
    %c0_5 = arith.constant 0 : index
    %c0_6 = arith.constant 0 : index
    %3 = vector.load %arg4[%c0_5, %c0_6] : memref<8x1xf32, #tpu.memory_space<vmem>>, vector<8x1xf32>
    %c0_7 = arith.constant 0 : index
    %c0_8 = arith.constant 0 : index
    %4 = vector.load %arg6[%c0_7, %c0_8] : memref<8x1xf32, #tpu.memory_space<vmem>>, vector<8x1xf32>
    %c0_9 = arith.constant 0 : index
    %c0_10 = arith.constant 0 : index
    %5 = vector.load %arg7[%c0_9, %c0_10] : memref<8x1xf32, #tpu.memory_space<vmem>>, vector<8x1xf32>
    %6 = tpu.iota {dimensions = array<i32: 1>} : vector<1x256xi32>
    %c4_i32 = arith.constant 4 : i32
    %7 = vector.broadcast %c4_i32 : i32 to vector<1x256xi32>
    %8 = arith.shrsi %6, %7 : vector<1x256xi32>
    %c15_i32 = arith.constant 15 : i32
    %9 = vector.broadcast %c15_i32 : i32 to vector<1x256xi32>
    %10 = arith.andi %6, %9 : vector<1x256xi32>
    %c1_i32 = arith.constant 1 : i32
    %11 = vector.broadcast %c1_i32 : i32 to vector<1x256xi32>
    %12 = arith.cmpi sge, %8, %11 : vector<1x256xi32>
    %c1_i32_11 = arith.constant 1 : i32
    %13 = vector.broadcast %c1_i32_11 : i32 to vector<1x256xi32>
    %14 = arith.cmpi sge, %10, %13 : vector<1x256xi32>
    %15 = arith.andi %12, %14 : vector<1x256xi1>
    %c1_i32_12 = arith.constant 1 : i32
    %16 = vector.broadcast %c1_i32_12 : i32 to vector<1x256xi32>
    %17 = arith.cmpi sge, %8, %16 : vector<1x256xi32>
    %c1_i32_13 = arith.constant 1 : i32
    %18 = vector.broadcast %c1_i32_13 : i32 to vector<1x256xi32>
    %19 = arith.cmpi sge, %8, %18 : vector<1x256xi32>
    %c15_i32_14 = arith.constant 15 : i32
    %20 = vector.broadcast %c15_i32_14 : i32 to vector<1x256xi32>
    %21 = arith.cmpi slt, %10, %20 : vector<1x256xi32>
    %22 = arith.andi %19, %21 : vector<1x256xi1>
    %c1_i32_15 = arith.constant 1 : i32
    %23 = vector.broadcast %c1_i32_15 : i32 to vector<1x256xi32>
    %24 = arith.cmpi sge, %10, %23 : vector<1x256xi32>
    %c15_i32_16 = arith.constant 15 : i32
    %25 = vector.broadcast %c15_i32_16 : i32 to vector<1x256xi32>
    %26 = arith.cmpi slt, %10, %25 : vector<1x256xi32>
    %c15_i32_17 = arith.constant 15 : i32
    %27 = vector.broadcast %c15_i32_17 : i32 to vector<1x256xi32>
    %28 = arith.cmpi slt, %8, %27 : vector<1x256xi32>
    %c1_i32_18 = arith.constant 1 : i32
    %29 = vector.broadcast %c1_i32_18 : i32 to vector<1x256xi32>
    %30 = arith.cmpi sge, %10, %29 : vector<1x256xi32>
    %31 = arith.andi %28, %30 : vector<1x256xi1>
    %c15_i32_19 = arith.constant 15 : i32
    %32 = vector.broadcast %c15_i32_19 : i32 to vector<1x256xi32>
    %33 = arith.cmpi slt, %8, %32 : vector<1x256xi32>
    %c15_i32_20 = arith.constant 15 : i32
    %34 = vector.broadcast %c15_i32_20 : i32 to vector<1x256xi32>
    %35 = arith.cmpi slt, %8, %34 : vector<1x256xi32>
    %c15_i32_21 = arith.constant 15 : i32
    %36 = vector.broadcast %c15_i32_21 : i32 to vector<1x256xi32>
    %37 = arith.cmpi slt, %10, %36 : vector<1x256xi32>
    %38 = arith.andi %35, %37 : vector<1x256xi1>
    %cst = arith.constant 0.000000e+00 : f32
    %39 = vector.broadcast %cst : f32 to vector<4x256xf32>
    %c0_22 = arith.constant 0 : index
    %c0_23 = arith.constant 0 : index
    %c0_24 = arith.constant 0 : index
    %40 = vector.load %arg1[%c0_22, %c0_23, %c0_24] : memref<2x4x256xf32, #tpu.memory_space<vmem>>, vector<1x4x256xf32>
    %41 = vector.shape_cast %40 : vector<1x4x256xf32> to vector<4x256xf32>
    %42 = tpu.concatenate %41, %39 in 0 : vector<4x256xf32>, vector<4x256xf32> -> vector<8x256xf32>
    %c17_i32 = arith.constant 17 : i32
    %43 = tpu.dynamic_rotate %42 by %c17_i32 dim 1 : vector<8x256xf32>, i32 -> vector<8x256xf32>
    %cst_25 = arith.constant 0.000000e+00 : f32
    %44 = vector.shape_cast %15 : vector<1x256xi1> to vector<1x256xi1>
    %45 = vector.broadcast %44 : vector<1x256xi1> to vector<8x256xi1>
    %46 = vector.broadcast %cst_25 : f32 to vector<8x256xf32>
    %47 = arith.select %45, %43, %46 : vector<8x256xi1>, vector<8x256xf32>
    %c16_i32 = arith.constant 16 : i32
    %48 = tpu.dynamic_rotate %42 by %c16_i32 dim 1 : vector<8x256xf32>, i32 -> vector<8x256xf32>
    %cst_26 = arith.constant 0.000000e+00 : f32
    %49 = vector.shape_cast %17 : vector<1x256xi1> to vector<1x256xi1>
    %50 = vector.broadcast %49 : vector<1x256xi1> to vector<8x256xi1>
    %51 = vector.broadcast %cst_26 : f32 to vector<8x256xf32>
    %52 = arith.select %50, %48, %51 : vector<8x256xi1>, vector<8x256xf32>
    %c15_i32_27 = arith.constant 15 : i32
    %53 = tpu.dynamic_rotate %42 by %c15_i32_27 dim 1 : vector<8x256xf32>, i32 -> vector<8x256xf32>
    %cst_28 = arith.constant 0.000000e+00 : f32
    %54 = vector.shape_cast %22 : vector<1x256xi1> to vector<1x256xi1>
    %55 = vector.broadcast %54 : vector<1x256xi1> to vector<8x256xi1>
    %56 = vector.broadcast %cst_28 : f32 to vector<8x256xf32>
    %57 = arith.select %55, %53, %56 : vector<8x256xi1>, vector<8x256xf32>
    %c1_i32_29 = arith.constant 1 : i32
    %58 = tpu.dynamic_rotate %42 by %c1_i32_29 dim 1 : vector<8x256xf32>, i32 -> vector<8x256xf32>
    %cst_30 = arith.constant 0.000000e+00 : f32
    %59 = vector.shape_cast %24 : vector<1x256xi1> to vector<1x256xi1>
    %60 = vector.broadcast %59 : vector<1x256xi1> to vector<8x256xi1>
    %61 = vector.broadcast %cst_30 : f32 to vector<8x256xf32>
    %62 = arith.select %60, %58, %61 : vector<8x256xi1>, vector<8x256xf32>
    %c255_i32 = arith.constant 255 : i32
    %63 = tpu.dynamic_rotate %42 by %c255_i32 dim 1 : vector<8x256xf32>, i32 -> vector<8x256xf32>
    %cst_31 = arith.constant 0.000000e+00 : f32
    %64 = vector.shape_cast %26 : vector<1x256xi1> to vector<1x256xi1>
    %65 = vector.broadcast %64 : vector<1x256xi1> to vector<8x256xi1>
    %66 = vector.broadcast %cst_31 : f32 to vector<8x256xf32>
    %67 = arith.select %65, %63, %66 : vector<8x256xi1>, vector<8x256xf32>
    %c241_i32 = arith.constant 241 : i32
    %68 = tpu.dynamic_rotate %42 by %c241_i32 dim 1 : vector<8x256xf32>, i32 -> vector<8x256xf32>
    %cst_32 = arith.constant 0.000000e+00 : f32
    %69 = vector.shape_cast %31 : vector<1x256xi1> to vector<1x256xi1>
    %70 = vector.broadcast %69 : vector<1x256xi1> to vector<8x256xi1>
    %71 = vector.broadcast %cst_32 : f32 to vector<8x256xf32>
    %72 = arith.select %70, %68, %71 : vector<8x256xi1>, vector<8x256xf32>
    %c240_i32 = arith.constant 240 : i32
    %73 = tpu.dynamic_rotate %42 by %c240_i32 dim 1 : vector<8x256xf32>, i32 -> vector<8x256xf32>
    %cst_33 = arith.constant 0.000000e+00 : f32
    %74 = vector.shape_cast %33 : vector<1x256xi1> to vector<1x256xi1>
    %75 = vector.broadcast %74 : vector<1x256xi1> to vector<8x256xi1>
    %76 = vector.broadcast %cst_33 : f32 to vector<8x256xf32>
    %77 = arith.select %75, %73, %76 : vector<8x256xi1>, vector<8x256xf32>
    %c239_i32 = arith.constant 239 : i32
    %78 = tpu.dynamic_rotate %42 by %c239_i32 dim 1 : vector<8x256xf32>, i32 -> vector<8x256xf32>
    %cst_34 = arith.constant 0.000000e+00 : f32
    %79 = vector.shape_cast %38 : vector<1x256xi1> to vector<1x256xi1>
    %80 = vector.broadcast %79 : vector<1x256xi1> to vector<8x256xi1>
    %81 = vector.broadcast %cst_34 : f32 to vector<8x256xf32>
    %82 = arith.select %80, %78, %81 : vector<8x256xi1>, vector<8x256xf32>
    %83 = tpu.concatenate %47, %52, %57, %62, %42, %67, %72, %77, %82 in 0 : vector<8x256xf32>, vector<8x256xf32>, vector<8x256xf32>, vector<8x256xf32>, vector<8x256xf32>, vector<8x256xf32>, vector<8x256xf32>, vector<8x256xf32>, vector<8x256xf32> -> vector<72x256xf32>
    %cst_35 = arith.constant dense<0.000000e+00> : vector<8x256xf32>
    %84 = tpu.matmul %0, %83, %cst_35 {dimension_numbers = #tpu.dot_dimension_numbers<[1], [0], [0], [1], [0, 0, 1, 1], [], []>} : vector<8x72xf32>, vector<72x256xf32>, vector<8x256xf32> -> vector<8x256xf32>
    %cst_36 = arith.constant dense<0.000000e+00> : vector<8xf32>
    %85 = vector.multi_reduction <add>, %84, %cst_36 [1] : vector<8x256xf32> to vector<8xf32>
    %86 = vector.shape_cast %85 : vector<8xf32> to vector<8x1xf32>
    %87 = arith.mulf %84, %84 : vector<8x256xf32>
    %cst_37 = arith.constant dense<0.000000e+00> : vector<8xf32>
    %88 = vector.multi_reduction <add>, %87, %cst_37 [1] : vector<8x256xf32> to vector<8xf32>
    %89 = vector.shape_cast %88 : vector<8xf32> to vector<8x1xf32>
    %cst_38 = arith.constant 3.906250e-03 : f32
    %90 = vector.broadcast %cst_38 : f32 to vector<8x1xf32>
    %91 = arith.mulf %86, %90 : vector<8x1xf32>
    %cst_39 = arith.constant 3.906250e-03 : f32
    %92 = vector.broadcast %cst_39 : f32 to vector<8x1xf32>
    %93 = arith.mulf %89, %92 : vector<8x1xf32>
    %94 = arith.mulf %91, %91 : vector<8x1xf32>
    %95 = arith.subf %93, %94 : vector<8x1xf32>
    %cst_40 = arith.constant 0.000000e+00 : f32
    %96 = vector.broadcast %cst_40 : f32 to vector<8x1xf32>
    %97 = arith.maximumf %95, %96 : vector<8x1xf32>
    %cst_41 = arith.constant 9.99999974E-6 : f32
    %98 = vector.broadcast %cst_41 : f32 to vector<8x1xf32>
    %99 = arith.addf %97, %98 : vector<8x1xf32>
    %100 = math.rsqrt %99 : vector<8x1xf32>
    %101 = vector.broadcast %91 : vector<8x1xf32> to vector<8x256xf32>
    %102 = arith.subf %84, %101 : vector<8x256xf32>
    %103 = vector.broadcast %100 : vector<8x1xf32> to vector<8x256xf32>
    %104 = arith.mulf %102, %103 : vector<8x256xf32>
    %105 = vector.broadcast %2 : vector<8x1xf32> to vector<8x256xf32>
    %106 = arith.mulf %104, %105 : vector<8x256xf32>
    %107 = vector.broadcast %3 : vector<8x1xf32> to vector<8x256xf32>
    %108 = arith.addf %106, %107 : vector<8x256xf32>
    %cst_42 = arith.constant 0.000000e+00 : f32
    %109 = vector.broadcast %cst_42 : f32 to vector<8x256xf32>
    %110 = arith.maximumf %108, %109 : vector<8x256xf32>
    %c17_i32_43 = arith.constant 17 : i32
    %111 = tpu.dynamic_rotate %110 by %c17_i32_43 dim 1 : vector<8x256xf32>, i32 -> vector<8x256xf32>
    %cst_44 = arith.constant 0.000000e+00 : f32
    %112 = vector.shape_cast %15 : vector<1x256xi1> to vector<1x256xi1>
    %113 = vector.broadcast %112 : vector<1x256xi1> to vector<8x256xi1>
    %114 = vector.broadcast %cst_44 : f32 to vector<8x256xf32>
    %115 = arith.select %113, %111, %114 : vector<8x256xi1>, vector<8x256xf32>
    %c16_i32_45 = arith.constant 16 : i32
    %116 = tpu.dynamic_rotate %110 by %c16_i32_45 dim 1 : vector<8x256xf32>, i32 -> vector<8x256xf32>
    %cst_46 = arith.constant 0.000000e+00 : f32
    %117 = vector.shape_cast %17 : vector<1x256xi1> to vector<1x256xi1>
    %118 = vector.broadcast %117 : vector<1x256xi1> to vector<8x256xi1>
    %119 = vector.broadcast %cst_46 : f32 to vector<8x256xf32>
    %120 = arith.select %118, %116, %119 : vector<8x256xi1>, vector<8x256xf32>
    %c15_i32_47 = arith.constant 15 : i32
    %121 = tpu.dynamic_rotate %110 by %c15_i32_47 dim 1 : vector<8x256xf32>, i32 -> vector<8x256xf32>
    %cst_48 = arith.constant 0.000000e+00 : f32
    %122 = vector.shape_cast %22 : vector<1x256xi1> to vector<1x256xi1>
    %123 = vector.broadcast %122 : vector<1x256xi1> to vector<8x256xi1>
    %124 = vector.broadcast %cst_48 : f32 to vector<8x256xf32>
    %125 = arith.select %123, %121, %124 : vector<8x256xi1>, vector<8x256xf32>
    %c1_i32_49 = arith.constant 1 : i32
    %126 = tpu.dynamic_rotate %110 by %c1_i32_49 dim 1 : vector<8x256xf32>, i32 -> vector<8x256xf32>
    %cst_50 = arith.constant 0.000000e+00 : f32
    %127 = vector.shape_cast %24 : vector<1x256xi1> to vector<1x256xi1>
    %128 = vector.broadcast %127 : vector<1x256xi1> to vector<8x256xi1>
    %129 = vector.broadcast %cst_50 : f32 to vector<8x256xf32>
    %130 = arith.select %128, %126, %129 : vector<8x256xi1>, vector<8x256xf32>
    %c255_i32_51 = arith.constant 255 : i32
    %131 = tpu.dynamic_rotate %110 by %c255_i32_51 dim 1 : vector<8x256xf32>, i32 -> vector<8x256xf32>
    %cst_52 = arith.constant 0.000000e+00 : f32
    %132 = vector.shape_cast %26 : vector<1x256xi1> to vector<1x256xi1>
    %133 = vector.broadcast %132 : vector<1x256xi1> to vector<8x256xi1>
    %134 = vector.broadcast %cst_52 : f32 to vector<8x256xf32>
    %135 = arith.select %133, %131, %134 : vector<8x256xi1>, vector<8x256xf32>
    %c241_i32_53 = arith.constant 241 : i32
    %136 = tpu.dynamic_rotate %110 by %c241_i32_53 dim 1 : vector<8x256xf32>, i32 -> vector<8x256xf32>
    %cst_54 = arith.constant 0.000000e+00 : f32
    %137 = vector.shape_cast %31 : vector<1x256xi1> to vector<1x256xi1>
    %138 = vector.broadcast %137 : vector<1x256xi1> to vector<8x256xi1>
    %139 = vector.broadcast %cst_54 : f32 to vector<8x256xf32>
    %140 = arith.select %138, %136, %139 : vector<8x256xi1>, vector<8x256xf32>
    %c240_i32_55 = arith.constant 240 : i32
    %141 = tpu.dynamic_rotate %110 by %c240_i32_55 dim 1 : vector<8x256xf32>, i32 -> vector<8x256xf32>
    %cst_56 = arith.constant 0.000000e+00 : f32
    %142 = vector.shape_cast %33 : vector<1x256xi1> to vector<1x256xi1>
    %143 = vector.broadcast %142 : vector<1x256xi1> to vector<8x256xi1>
    %144 = vector.broadcast %cst_56 : f32 to vector<8x256xf32>
    %145 = arith.select %143, %141, %144 : vector<8x256xi1>, vector<8x256xf32>
    %c239_i32_57 = arith.constant 239 : i32
    %146 = tpu.dynamic_rotate %110 by %c239_i32_57 dim 1 : vector<8x256xf32>, i32 -> vector<8x256xf32>
    %cst_58 = arith.constant 0.000000e+00 : f32
    %147 = vector.shape_cast %38 : vector<1x256xi1> to vector<1x256xi1>
    %148 = vector.broadcast %147 : vector<1x256xi1> to vector<8x256xi1>
    %149 = vector.broadcast %cst_58 : f32 to vector<8x256xf32>
    %150 = arith.select %148, %146, %149 : vector<8x256xi1>, vector<8x256xf32>
    %151 = tpu.concatenate %115, %120, %125, %130, %110, %135, %140, %145, %150 in 0 : vector<8x256xf32>, vector<8x256xf32>, vector<8x256xf32>, vector<8x256xf32>, vector<8x256xf32>, vector<8x256xf32>, vector<8x256xf32>, vector<8x256xf32>, vector<8x256xf32> -> vector<72x256xf32>
    %cst_59 = arith.constant dense<0.000000e+00> : vector<8x256xf32>
    %152 = tpu.matmul %1, %151, %cst_59 {dimension_numbers = #tpu.dot_dimension_numbers<[1], [0], [0], [1], [0, 0, 1, 1], [], []>} : vector<8x72xf32>, vector<72x256xf32>, vector<8x256xf32> -> vector<8x256xf32>
    %cst_60 = arith.constant dense<0.000000e+00> : vector<8xf32>
    %153 = vector.multi_reduction <add>, %152, %cst_60 [1] : vector<8x256xf32> to vector<8xf32>
    %154 = vector.shape_cast %153 : vector<8xf32> to vector<8x1xf32>
    %155 = arith.mulf %152, %152 : vector<8x256xf32>
    %cst_61 = arith.constant dense<0.000000e+00> : vector<8xf32>
    %156 = vector.multi_reduction <add>, %155, %cst_61 [1] : vector<8x256xf32> to vector<8xf32>
    %157 = vector.shape_cast %156 : vector<8xf32> to vector<8x1xf32>
    %cst_62 = arith.constant 3.906250e-03 : f32
    %158 = vector.broadcast %cst_62 : f32 to vector<8x1xf32>
    %159 = arith.mulf %154, %158 : vector<8x1xf32>
    %cst_63 = arith.constant 3.906250e-03 : f32
    %160 = vector.broadcast %cst_63 : f32 to vector<8x1xf32>
    %161 = arith.mulf %157, %160 : vector<8x1xf32>
    %162 = arith.mulf %159, %159 : vector<8x1xf32>
    %163 = arith.subf %161, %162 : vector<8x1xf32>
    %cst_64 = arith.constant 0.000000e+00 : f32
    %164 = vector.broadcast %cst_64 : f32 to vector<8x1xf32>
    %165 = arith.maximumf %163, %164 : vector<8x1xf32>
    %cst_65 = arith.constant 9.99999974E-6 : f32
    %166 = vector.broadcast %cst_65 : f32 to vector<8x1xf32>
    %167 = arith.addf %165, %166 : vector<8x1xf32>
    %168 = math.rsqrt %167 : vector<8x1xf32>
    %169 = vector.broadcast %159 : vector<8x1xf32> to vector<8x256xf32>
    %170 = arith.subf %152, %169 : vector<8x256xf32>
    %171 = vector.broadcast %168 : vector<8x1xf32> to vector<8x256xf32>
    %172 = arith.mulf %170, %171 : vector<8x256xf32>
    %173 = vector.broadcast %4 : vector<8x1xf32> to vector<8x256xf32>
    %174 = arith.mulf %172, %173 : vector<8x256xf32>
    %175 = vector.broadcast %5 : vector<8x1xf32> to vector<8x256xf32>
    %176 = arith.addf %174, %175 : vector<8x256xf32>
    %cst_66 = arith.constant 0.000000e+00 : f32
    %177 = vector.broadcast %cst_66 : f32 to vector<8x256xf32>
    %178 = arith.maximumf %176, %177 : vector<8x256xf32>
    %179 = vector.extract_strided_slice %178 {offsets = [0, 0], sizes = [4, 256], strides = [1, 1]} : vector<8x256xf32> to vector<4x256xf32>
    %180 = arith.addf %179, %41 : vector<4x256xf32>
    %c0_67 = arith.constant 0 : index
    %c0_68 = arith.constant 0 : index
    %c0_69 = arith.constant 0 : index
    %181 = vector.load %arg8[%c0_67, %c0_68, %c0_69] : memref<2x4x256xf32, #tpu.memory_space<vmem>>, vector<1x4x256xf32>
    %182 = vector.shape_cast %181 : vector<1x4x256xf32> to vector<4x256xf32>
    %183 = vector.shape_cast %180 : vector<4x256xf32> to vector<1x4x256xf32>
    tpu.vector_store %arg8[%c0_67, %c0_68, %c0_69], %183 {strides = array<i32>} : memref<2x4x256xf32, #tpu.memory_space<vmem>>, vector<1x4x256xf32>,
    %c1 = arith.constant 1 : index
    %c0_70 = arith.constant 0 : index
    %c0_71 = arith.constant 0 : index
    %184 = vector.load %arg1[%c1, %c0_70, %c0_71] : memref<2x4x256xf32, #tpu.memory_space<vmem>>, vector<1x4x256xf32>
    %185 = vector.shape_cast %184 : vector<1x4x256xf32> to vector<4x256xf32>
    %186 = tpu.concatenate %185, %39 in 0 : vector<4x256xf32>, vector<4x256xf32> -> vector<8x256xf32>
    %c17_i32_72 = arith.constant 17 : i32
    %187 = tpu.dynamic_rotate %186 by %c17_i32_72 dim 1 : vector<8x256xf32>, i32 -> vector<8x256xf32>
    %cst_73 = arith.constant 0.000000e+00 : f32
    %188 = vector.shape_cast %15 : vector<1x256xi1> to vector<1x256xi1>
    %189 = vector.broadcast %188 : vector<1x256xi1> to vector<8x256xi1>
    %190 = vector.broadcast %cst_73 : f32 to vector<8x256xf32>
    %191 = arith.select %189, %187, %190 : vector<8x256xi1>, vector<8x256xf32>
    %c16_i32_74 = arith.constant 16 : i32
    %192 = tpu.dynamic_rotate %186 by %c16_i32_74 dim 1 : vector<8x256xf32>, i32 -> vector<8x256xf32>
    %cst_75 = arith.constant 0.000000e+00 : f32
    %193 = vector.shape_cast %17 : vector<1x256xi1> to vector<1x256xi1>
    %194 = vector.broadcast %193 : vector<1x256xi1> to vector<8x256xi1>
    %195 = vector.broadcast %cst_75 : f32 to vector<8x256xf32>
    %196 = arith.select %194, %192, %195 : vector<8x256xi1>, vector<8x256xf32>
    %c15_i32_76 = arith.constant 15 : i32
    %197 = tpu.dynamic_rotate %186 by %c15_i32_76 dim 1 : vector<8x256xf32>, i32 -> vector<8x256xf32>
    %cst_77 = arith.constant 0.000000e+00 : f32
    %198 = vector.shape_cast %22 : vector<1x256xi1> to vector<1x256xi1>
    %199 = vector.broadcast %198 : vector<1x256xi1> to vector<8x256xi1>
    %200 = vector.broadcast %cst_77 : f32 to vector<8x256xf32>
    %201 = arith.select %199, %197, %200 : vector<8x256xi1>, vector<8x256xf32>
    %c1_i32_78 = arith.constant 1 : i32
    %202 = tpu.dynamic_rotate %186 by %c1_i32_78 dim 1 : vector<8x256xf32>, i32 -> vector<8x256xf32>
    %cst_79 = arith.constant 0.000000e+00 : f32
    %203 = vector.shape_cast %24 : vector<1x256xi1> to vector<1x256xi1>
    %204 = vector.broadcast %203 : vector<1x256xi1> to vector<8x256xi1>
    %205 = vector.broadcast %cst_79 : f32 to vector<8x256xf32>
    %206 = arith.select %204, %202, %205 : vector<8x256xi1>, vector<8x256xf32>
    %c255_i32_80 = arith.constant 255 : i32
    %207 = tpu.dynamic_rotate %186 by %c255_i32_80 dim 1 : vector<8x256xf32>, i32 -> vector<8x256xf32>
    %cst_81 = arith.constant 0.000000e+00 : f32
    %208 = vector.shape_cast %26 : vector<1x256xi1> to vector<1x256xi1>
    %209 = vector.broadcast %208 : vector<1x256xi1> to vector<8x256xi1>
    %210 = vector.broadcast %cst_81 : f32 to vector<8x256xf32>
    %211 = arith.select %209, %207, %210 : vector<8x256xi1>, vector<8x256xf32>
    %c241_i32_82 = arith.constant 241 : i32
    %212 = tpu.dynamic_rotate %186 by %c241_i32_82 dim 1 : vector<8x256xf32>, i32 -> vector<8x256xf32>
    %cst_83 = arith.constant 0.000000e+00 : f32
    %213 = vector.shape_cast %31 : vector<1x256xi1> to vector<1x256xi1>
    %214 = vector.broadcast %213 : vector<1x256xi1> to vector<8x256xi1>
    %215 = vector.broadcast %cst_83 : f32 to vector<8x256xf32>
    %216 = arith.select %214, %212, %215 : vector<8x256xi1>, vector<8x256xf32>
    %c240_i32_84 = arith.constant 240 : i32
    %217 = tpu.dynamic_rotate %186 by %c240_i32_84 dim 1 : vector<8x256xf32>, i32 -> vector<8x256xf32>
    %cst_85 = arith.constant 0.000000e+00 : f32
    %218 = vector.shape_cast %33 : vector<1x256xi1> to vector<1x256xi1>
    %219 = vector.broadcast %218 : vector<1x256xi1> to vector<8x256xi1>
    %220 = vector.broadcast %cst_85 : f32 to vector<8x256xf32>
    %221 = arith.select %219, %217, %220 : vector<8x256xi1>, vector<8x256xf32>
    %c239_i32_86 = arith.constant 239 : i32
    %222 = tpu.dynamic_rotate %186 by %c239_i32_86 dim 1 : vector<8x256xf32>, i32 -> vector<8x256xf32>
    %cst_87 = arith.constant 0.000000e+00 : f32
    %223 = vector.shape_cast %38 : vector<1x256xi1> to vector<1x256xi1>
    %224 = vector.broadcast %223 : vector<1x256xi1> to vector<8x256xi1>
    %225 = vector.broadcast %cst_87 : f32 to vector<8x256xf32>
    %226 = arith.select %224, %222, %225 : vector<8x256xi1>, vector<8x256xf32>
    %227 = tpu.concatenate %191, %196, %201, %206, %186, %211, %216, %221, %226 in 0 : vector<8x256xf32>, vector<8x256xf32>, vector<8x256xf32>, vector<8x256xf32>, vector<8x256xf32>, vector<8x256xf32>, vector<8x256xf32>, vector<8x256xf32>, vector<8x256xf32> -> vector<72x256xf32>
    %cst_88 = arith.constant dense<0.000000e+00> : vector<8x256xf32>
    %228 = tpu.matmul %0, %227, %cst_88 {dimension_numbers = #tpu.dot_dimension_numbers<[1], [0], [0], [1], [0, 0, 1, 1], [], []>} : vector<8x72xf32>, vector<72x256xf32>, vector<8x256xf32> -> vector<8x256xf32>
    %cst_89 = arith.constant dense<0.000000e+00> : vector<8xf32>
    %229 = vector.multi_reduction <add>, %228, %cst_89 [1] : vector<8x256xf32> to vector<8xf32>
    %230 = vector.shape_cast %229 : vector<8xf32> to vector<8x1xf32>
    %231 = arith.mulf %228, %228 : vector<8x256xf32>
    %cst_90 = arith.constant dense<0.000000e+00> : vector<8xf32>
    %232 = vector.multi_reduction <add>, %231, %cst_90 [1] : vector<8x256xf32> to vector<8xf32>
    %233 = vector.shape_cast %232 : vector<8xf32> to vector<8x1xf32>
    %cst_91 = arith.constant 3.906250e-03 : f32
    %234 = vector.broadcast %cst_91 : f32 to vector<8x1xf32>
    %235 = arith.mulf %230, %234 : vector<8x1xf32>
    %cst_92 = arith.constant 3.906250e-03 : f32
    %236 = vector.broadcast %cst_92 : f32 to vector<8x1xf32>
    %237 = arith.mulf %233, %236 : vector<8x1xf32>
    %238 = arith.mulf %235, %235 : vector<8x1xf32>
    %239 = arith.subf %237, %238 : vector<8x1xf32>
    %cst_93 = arith.constant 0.000000e+00 : f32
    %240 = vector.broadcast %cst_93 : f32 to vector<8x1xf32>
    %241 = arith.maximumf %239, %240 : vector<8x1xf32>
    %cst_94 = arith.constant 9.99999974E-6 : f32
    %242 = vector.broadcast %cst_94 : f32 to vector<8x1xf32>
    %243 = arith.addf %241, %242 : vector<8x1xf32>
    %244 = math.rsqrt %243 : vector<8x1xf32>
    %245 = vector.broadcast %235 : vector<8x1xf32> to vector<8x256xf32>
    %246 = arith.subf %228, %245 : vector<8x256xf32>
    %247 = vector.broadcast %244 : vector<8x1xf32> to vector<8x256xf32>
    %248 = arith.mulf %246, %247 : vector<8x256xf32>
    %249 = vector.broadcast %2 : vector<8x1xf32> to vector<8x256xf32>
    %250 = arith.mulf %248, %249 : vector<8x256xf32>
    %251 = vector.broadcast %3 : vector<8x1xf32> to vector<8x256xf32>
    %252 = arith.addf %250, %251 : vector<8x256xf32>
    %cst_95 = arith.constant 0.000000e+00 : f32
    %253 = vector.broadcast %cst_95 : f32 to vector<8x256xf32>
    %254 = arith.maximumf %252, %253 : vector<8x256xf32>
    %c17_i32_96 = arith.constant 17 : i32
    %255 = tpu.dynamic_rotate %254 by %c17_i32_96 dim 1 : vector<8x256xf32>, i32 -> vector<8x256xf32>
    %cst_97 = arith.constant 0.000000e+00 : f32
    %256 = vector.shape_cast %15 : vector<1x256xi1> to vector<1x256xi1>
    %257 = vector.broadcast %256 : vector<1x256xi1> to vector<8x256xi1>
    %258 = vector.broadcast %cst_97 : f32 to vector<8x256xf32>
    %259 = arith.select %257, %255, %258 : vector<8x256xi1>, vector<8x256xf32>
    %c16_i32_98 = arith.constant 16 : i32
    %260 = tpu.dynamic_rotate %254 by %c16_i32_98 dim 1 : vector<8x256xf32>, i32 -> vector<8x256xf32>
    %cst_99 = arith.constant 0.000000e+00 : f32
    %261 = vector.shape_cast %17 : vector<1x256xi1> to vector<1x256xi1>
    %262 = vector.broadcast %261 : vector<1x256xi1> to vector<8x256xi1>
    %263 = vector.broadcast %cst_99 : f32 to vector<8x256xf32>
    %264 = arith.select %262, %260, %263 : vector<8x256xi1>, vector<8x256xf32>
    %c15_i32_100 = arith.constant 15 : i32
    %265 = tpu.dynamic_rotate %254 by %c15_i32_100 dim 1 : vector<8x256xf32>, i32 -> vector<8x256xf32>
    %cst_101 = arith.constant 0.000000e+00 : f32
    %266 = vector.shape_cast %22 : vector<1x256xi1> to vector<1x256xi1>
    %267 = vector.broadcast %266 : vector<1x256xi1> to vector<8x256xi1>
    %268 = vector.broadcast %cst_101 : f32 to vector<8x256xf32>
    %269 = arith.select %267, %265, %268 : vector<8x256xi1>, vector<8x256xf32>
    %c1_i32_102 = arith.constant 1 : i32
    %270 = tpu.dynamic_rotate %254 by %c1_i32_102 dim 1 : vector<8x256xf32>, i32 -> vector<8x256xf32>
    %cst_103 = arith.constant 0.000000e+00 : f32
    %271 = vector.shape_cast %24 : vector<1x256xi1> to vector<1x256xi1>
    %272 = vector.broadcast %271 : vector<1x256xi1> to vector<8x256xi1>
    %273 = vector.broadcast %cst_103 : f32 to vector<8x256xf32>
    %274 = arith.select %272, %270, %273 : vector<8x256xi1>, vector<8x256xf32>
    %c255_i32_104 = arith.constant 255 : i32
    %275 = tpu.dynamic_rotate %254 by %c255_i32_104 dim 1 : vector<8x256xf32>, i32 -> vector<8x256xf32>
    %cst_105 = arith.constant 0.000000e+00 : f32
    %276 = vector.shape_cast %26 : vector<1x256xi1> to vector<1x256xi1>
    %277 = vector.broadcast %276 : vector<1x256xi1> to vector<8x256xi1>
    %278 = vector.broadcast %cst_105 : f32 to vector<8x256xf32>
    %279 = arith.select %277, %275, %278 : vector<8x256xi1>, vector<8x256xf32>
    %c241_i32_106 = arith.constant 241 : i32
    %280 = tpu.dynamic_rotate %254 by %c241_i32_106 dim 1 : vector<8x256xf32>, i32 -> vector<8x256xf32>
    %cst_107 = arith.constant 0.000000e+00 : f32
    %281 = vector.shape_cast %31 : vector<1x256xi1> to vector<1x256xi1>
    %282 = vector.broadcast %281 : vector<1x256xi1> to vector<8x256xi1>
    %283 = vector.broadcast %cst_107 : f32 to vector<8x256xf32>
    %284 = arith.select %282, %280, %283 : vector<8x256xi1>, vector<8x256xf32>
    %c240_i32_108 = arith.constant 240 : i32
    %285 = tpu.dynamic_rotate %254 by %c240_i32_108 dim 1 : vector<8x256xf32>, i32 -> vector<8x256xf32>
    %cst_109 = arith.constant 0.000000e+00 : f32
    %286 = vector.shape_cast %33 : vector<1x256xi1> to vector<1x256xi1>
    %287 = vector.broadcast %286 : vector<1x256xi1> to vector<8x256xi1>
    %288 = vector.broadcast %cst_109 : f32 to vector<8x256xf32>
    %289 = arith.select %287, %285, %288 : vector<8x256xi1>, vector<8x256xf32>
    %c239_i32_110 = arith.constant 239 : i32
    %290 = tpu.dynamic_rotate %254 by %c239_i32_110 dim 1 : vector<8x256xf32>, i32 -> vector<8x256xf32>
    %cst_111 = arith.constant 0.000000e+00 : f32
    %291 = vector.shape_cast %38 : vector<1x256xi1> to vector<1x256xi1>
    %292 = vector.broadcast %291 : vector<1x256xi1> to vector<8x256xi1>
    %293 = vector.broadcast %cst_111 : f32 to vector<8x256xf32>
    %294 = arith.select %292, %290, %293 : vector<8x256xi1>, vector<8x256xf32>
    %295 = tpu.concatenate %259, %264, %269, %274, %254, %279, %284, %289, %294 in 0 : vector<8x256xf32>, vector<8x256xf32>, vector<8x256xf32>, vector<8x256xf32>, vector<8x256xf32>, vector<8x256xf32>, vector<8x256xf32>, vector<8x256xf32>, vector<8x256xf32> -> vector<72x256xf32>
    %cst_112 = arith.constant dense<0.000000e+00> : vector<8x256xf32>
    %296 = tpu.matmul %1, %295, %cst_112 {dimension_numbers = #tpu.dot_dimension_numbers<[1], [0], [0], [1], [0, 0, 1, 1], [], []>} : vector<8x72xf32>, vector<72x256xf32>, vector<8x256xf32> -> vector<8x256xf32>
    %cst_113 = arith.constant dense<0.000000e+00> : vector<8xf32>
    %297 = vector.multi_reduction <add>, %296, %cst_113 [1] : vector<8x256xf32> to vector<8xf32>
    %298 = vector.shape_cast %297 : vector<8xf32> to vector<8x1xf32>
    %299 = arith.mulf %296, %296 : vector<8x256xf32>
    %cst_114 = arith.constant dense<0.000000e+00> : vector<8xf32>
    %300 = vector.multi_reduction <add>, %299, %cst_114 [1] : vector<8x256xf32> to vector<8xf32>
    %301 = vector.shape_cast %300 : vector<8xf32> to vector<8x1xf32>
    %cst_115 = arith.constant 3.906250e-03 : f32
    %302 = vector.broadcast %cst_115 : f32 to vector<8x1xf32>
    %303 = arith.mulf %298, %302 : vector<8x1xf32>
    %cst_116 = arith.constant 3.906250e-03 : f32
    %304 = vector.broadcast %cst_116 : f32 to vector<8x1xf32>
    %305 = arith.mulf %301, %304 : vector<8x1xf32>
    %306 = arith.mulf %303, %303 : vector<8x1xf32>
    %307 = arith.subf %305, %306 : vector<8x1xf32>
    %cst_117 = arith.constant 0.000000e+00 : f32
    %308 = vector.broadcast %cst_117 : f32 to vector<8x1xf32>
    %309 = arith.maximumf %307, %308 : vector<8x1xf32>
    %cst_118 = arith.constant 9.99999974E-6 : f32
    %310 = vector.broadcast %cst_118 : f32 to vector<8x1xf32>
    %311 = arith.addf %309, %310 : vector<8x1xf32>
    %312 = math.rsqrt %311 : vector<8x1xf32>
    %313 = vector.broadcast %303 : vector<8x1xf32> to vector<8x256xf32>
    %314 = arith.subf %296, %313 : vector<8x256xf32>
    %315 = vector.broadcast %312 : vector<8x1xf32> to vector<8x256xf32>
    %316 = arith.mulf %314, %315 : vector<8x256xf32>
    %317 = vector.broadcast %4 : vector<8x1xf32> to vector<8x256xf32>
    %318 = arith.mulf %316, %317 : vector<8x256xf32>
    %319 = vector.broadcast %5 : vector<8x1xf32> to vector<8x256xf32>
    %320 = arith.addf %318, %319 : vector<8x256xf32>
    %cst_119 = arith.constant 0.000000e+00 : f32
    %321 = vector.broadcast %cst_119 : f32 to vector<8x256xf32>
    %322 = arith.maximumf %320, %321 : vector<8x256xf32>
    %323 = vector.extract_strided_slice %322 {offsets = [0, 0], sizes = [4, 256], strides = [1, 1]} : vector<8x256xf32> to vector<4x256xf32>
    %324 = arith.addf %323, %185 : vector<4x256xf32>
    %c1_120 = arith.constant 1 : index
    %c0_121 = arith.constant 0 : index
    %c0_122 = arith.constant 0 : index
    %325 = vector.load %arg8[%c1_120, %c0_121, %c0_122] : memref<2x4x256xf32, #tpu.memory_space<vmem>>, vector<1x4x256xf32>
    %326 = vector.shape_cast %325 : vector<1x4x256xf32> to vector<4x256xf32>
    %327 = vector.shape_cast %324 : vector<4x256xf32> to vector<1x4x256xf32>
    tpu.vector_store %arg8[%c1_120, %c0_121, %c0_122], %327 {strides = array<i32>} : memref<2x4x256xf32, #tpu.memory_space<vmem>>, vector<1x4x256xf32>,
    return
  }
  func.func @transform_0(%arg0: i32) -> (i32, i32, i32) {
    %c0_i32 = arith.constant 0 : i32
    %c0_i32_0 = arith.constant 0 : i32
    %c0_i32_1 = arith.constant 0 : i32
    return %arg0, %c0_i32, %c0_i32_0 : i32, i32, i32
  }
  func.func @transform_1(%arg0: i32) -> (i32, i32) {
    %c0_i32 = arith.constant 0 : i32
    %c0_i32_0 = arith.constant 0 : i32
    %c0_i32_1 = arith.constant 0 : i32
    return %c0_i32, %c0_i32_0 : i32, i32
  }
  func.func @transform_2(%arg0: i32) -> (i32, i32) {
    %c0_i32 = arith.constant 0 : i32
    %c0_i32_0 = arith.constant 0 : i32
    %c0_i32_1 = arith.constant 0 : i32
    return %c0_i32, %c0_i32_0 : i32, i32
  }
  func.func @transform_3(%arg0: i32) -> (i32, i32) {
    %c0_i32 = arith.constant 0 : i32
    %c0_i32_0 = arith.constant 0 : i32
    %c0_i32_1 = arith.constant 0 : i32
    return %c0_i32, %c0_i32_0 : i32, i32
  }
  func.func @transform_4(%arg0: i32) -> (i32, i32) {
    %c0_i32 = arith.constant 0 : i32
    %c0_i32_0 = arith.constant 0 : i32
    %c0_i32_1 = arith.constant 0 : i32
    return %c0_i32, %c0_i32_0 : i32, i32
  }
  func.func @transform_5(%arg0: i32) -> (i32, i32) {
    %c0_i32 = arith.constant 0 : i32
    %c0_i32_0 = arith.constant 0 : i32
    %c0_i32_1 = arith.constant 0 : i32
    return %c0_i32, %c0_i32_0 : i32, i32
  }
  func.func @transform_6(%arg0: i32) -> (i32, i32) {
    %c0_i32 = arith.constant 0 : i32
    %c0_i32_0 = arith.constant 0 : i32
    %c0_i32_1 = arith.constant 0 : i32
    return %c0_i32, %c0_i32_0 : i32, i32
  }
  func.func @transform_7(%arg0: i32) -> (i32, i32, i32) {
    %c0_i32 = arith.constant 0 : i32
    %c0_i32_0 = arith.constant 0 : i32
    %c0_i32_1 = arith.constant 0 : i32
    return %arg0, %c0_i32, %c0_i32_0 : i32, i32, i32
  }
}

</mosaic_0001>

<bundles_post_ra>
// kernel: tpu_custom_call.1
= control target key start
LH: loop header
LB: loop body
LE: loop exit
PB: predicated region body
PF: predicated region fallthrough
CT: control target
= control target key end

     0   :  { %vm1539_vm0 = vcmask 1043456   ;;  %s1527_s0 = inlined_call_operand.vmem [shape: f32[2,4,256], index: 0, kind: input, shape index: {}]   ;;  %s1528_s1 = inlined_call_operand.vmem [shape: f32[8,72], index: 1, kind: input, shape index: {}]   ;;  %s1529_s2 = inlined_call_operand.vmem [shape: f32[8,1], index: 2, kind: input, shape index: {}]   ;;  %s1530_s3 = inlined_call_operand.vmem [shape: f32[8,1], index: 3, kind: input, shape index: {}]   ;;  %s1531_s4 = inlined_call_operand.vmem [shape: f32[8,72], index: 4, kind: input, shape index: {}]   ;;  %s1532_s5 = inlined_call_operand.vmem [shape: f32[8,1], index: 5, kind: input, shape index: {}]   ;;  %s1533_s6 = inlined_call_operand.vmem [shape: f32[8,1], index: 6, kind: input, shape index: {}]   ;;  %s1534_s7 = inlined_call_operand.hbm [shape: f32[2,4,256], index: 7, kind: output, shape index: {}]  }
   0x1   :  { %v984_v0 = vld [vmem:[%s1527_s0] sm:$0xff] }
   0x2   :  { %v61_v1 = vsel %vm1539_vm0, %v984_v0, 0.0  ;;  %v990_v2 = vcombine.high %v984_v0, %v984_v0 }
   0x3   :  { %12 = vsyncpa [#allocation3], 0  ;;  %s928_s26 = smov 112   ;;  %s929_s27 = smov 111   ;;  %v933_v4 = vmov 0.0   ;;  %v1011_v5 = vld [vmem:[%s1527_s0 + $0x8] sm:$0xff]  ;;  %v33_v9 = vlaneseq }
   0x4   :  { %141 = vrot.lane.b32.xlu1 %v61_v1, %s928_s26  ;;  %154 = vrot.lane.b32.xlu0 %v61_v1, %s929_s27  ;;  %v62_v3 = vsel %vm1539_vm0, %v990_v2, 0.0  ;;  %s930_s28 = smov 113   ;;  %s931_s29 = smov 127   ;;  %v1017_v6 = vcombine.high %v1011_v5, %v1011_v5  ;;  %v462_v8 = vsel %vm1539_vm0, %v1011_v5, 0.0  ;;  %v1564_v20 = vmov 0 }
   0x5   :  { %s932_s30 = smov 1   ;;  %235 = vmatprep.mubr.f32.mxu0 %v933_v4  ;;  %408 = vmatprep.mubr.f32.mxu1 %v933_v4  ;;  %s934_s8 = smov 15   ;;  %v1041_v10 = vand.u32 127, %v33_v9  ;;  %v1566_v21 = vmov 0  ;;  %v1574_v29 = vmov 0  ;;  %v1578_v35 = vmov 0 }
   0x6   :  { %s935_s11 = smov 16   ;;  %s936_s12 = smov 17   ;;  %v463_v7 = vsel %vm1539_vm0, %v1017_v6, 0.0  ;;  %v1580_v44 = vmov 0  ;;  %v1582_v47 = vmov 0  ;;  %v1586_v51 = vmov 0 }
   0x7   :  { %v35_v11 = vadd.s32 128, %v1041_v10  ;;  %v36_v14 = vshra.s32 %v1041_v10, 4  ;;  %v38_v15 = vand.u32 15, %v1041_v10  ;;  %vm1540_vm5 = vcmp.lt.s32.totalorder %v1041_v10, 111 }
   0x8   :  { %143 = vrot.lane.b32.xlu1 %v62_v3, %s928_s26  ;;  %156 = vrot.lane.b32.xlu0 %v62_v3, %s929_s27  ;;  %vm1537_vm7 = vcmp.lt.s32.totalorder %v1041_v10, 112  ;;  %vm1535_vm11 = vcmp.lt.s32.totalorder %v1041_v10, 113  ;;  %vm1536_vm14 = vcmp.lt.s32.totalorder %v1041_v10, 127  ;;  %vm1538_vm15 = vcmp.lt.s32.totalorder %v1041_v10, 1 }
   0x9   :  { %v37_v12 = vshra.s32 %v35_v11, 4  ;;  %v39_v13 = vand.u32 15, %v35_v11  ;;  %vm1054_vm3 = vcmp.lt.s32.totalorder %v38_v15, 15  ;;  %vm1058_vm4 = vcmp.lt.s32.totalorder %v36_v14, 15 }
   0xa   :  { %v1565_v20 = vsel %vm1054_vm3, 4294967295, %v1564_v20  ;;  %v1567_v21 = vsel %vm1058_vm4, 4294967295, %v1566_v21  ;;  %vm1076_vm8 = vmand %vm1058_vm4, %vm1054_vm3  ;;  %vm1088_vm10 = vcmp.ge.s32.totalorder %v38_v15, 1  ;;  %v1590_v61 = vmov 0 }
   0xb   :  { %vm1046_vm1 = vcmp.lt.s32.totalorder %v39_v13, 15  ;;  %vm1050_vm2 = vcmp.lt.s32.totalorder %v37_v12, 15  ;;  %vm1080_vm9 = vcmp.ge.s32.totalorder %v39_v13, 1  ;;  %v1575_v29 = vsel %vm1088_vm10, 4294967295, %v1574_v29  ;;  %vm1115_vm13 = vmand %vm1058_vm4, %vm1088_vm10 }
   0xc   :  { %130 = vrot.lane.b32.xlu1 %v62_v3, %s930_s28  ;;  %128 = vrot.lane.b32.xlu0 %v61_v1, %s930_s28  ;;  %vm1067_vm6 = vmand %vm1050_vm2, %vm1046_vm1  ;;  %v1579_v35 = vsel %vm1115_vm13, 4294967295, %v1578_v35 }
   0xd   :  { %vm1103_vm12 = vmand %vm1050_vm2, %vm1080_vm9 }
  0x10   :  { %117 = vrot.lane.b32.xlu1 %v62_v3, %s931_s29  ;;  %115 = vrot.lane.b32.xlu0 %v61_v1, %s931_s29 }
  0x14   :  { %104 = vrot.lane.b32.xlu1 %v62_v3, %s932_s30  ;;  %102 = vrot.lane.b32.xlu0 %v61_v1, %s932_s30 }
  0x18   :  { %91 = vrot.lane.b32.xlu1 %v62_v3, %s934_s8  ;;  %89 = vrot.lane.b32.xlu0 %v61_v1, %s934_s8 }
  0x1c   :  { %78 = vrot.lane.b32.xlu1 %v62_v3, %s935_s11  ;;  %76 = vrot.lane.b32.xlu0 %v61_v1, %s935_s11 }
  0x20   :  { %65 = vrot.lane.b32.xlu1 %v62_v3, %s936_s12  ;;  %63 = vrot.lane.b32.xlu0 %v61_v1, %s936_s12  ;;  %v27_v1 = vld [vmem:[%s1528_s1] sm:$0xff] }
  0x24   :  { %522 = vrot.lane.b32.xlu1 %v463_v7, %s929_s27  ;;  %520 = vrot.lane.b32.xlu0 %v462_v8, %s929_s27 }
  0x28   :  { %514 = vrot.lane.b32.xlu1 %v463_v7, %s928_s26  ;;  %512 = vrot.lane.b32.xlu0 %v462_v8, %s928_s26 }
  0x2c   :  { %506 = vrot.lane.b32.xlu1 %v463_v7, %s930_s28  ;;  %504 = vrot.lane.b32.xlu0 %v462_v8, %s930_s28 }
  0x30   :  { %498 = vrot.lane.b32.xlu1 %v463_v7, %s931_s29  ;;  %496 = vrot.lane.b32.xlu0 %v462_v8, %s931_s29 }
  0x34   :  { %490 = vrot.lane.b32.xlu1 %v463_v7, %s932_s30  ;;  %488 = vrot.lane.b32.xlu0 %v462_v8, %s932_s30 }
  0x38   :  { %482 = vrot.lane.b32.xlu1 %v463_v7, %s934_s8  ;;  %480 = vrot.lane.b32.xlu0 %v462_v8, %s934_s8 }
  0x3c   :  { %474 = vrot.lane.b32.xlu1 %v463_v7, %s935_s11  ;;  %472 = vrot.lane.b32.xlu0 %v462_v8, %s935_s11 }
  0x40   :  { %466 = vrot.lane.b32.xlu1 %v463_v7, %s936_s12  ;;  %464 = vrot.lane.b32.xlu0 %v462_v8, %s936_s12 }
  0x76   :  { %v142_v16 = vpop.permute.xlu1 %141  ;;  %v155_v17 = vpop.permute.xlu0 %154 }
  0x7a   :  { %v144_v23 = vpop.permute.xlu1 %143  ;;  %v157_v24 = vpop.permute.xlu0 %156 }
  0x7b   :  { %v160_v27 = vsel %vm1540_vm5, %v157_v24, %v155_v17  ;;  %v159_v28 = vsel %vm1540_vm5, %v155_v17, %v157_v24  ;;  %v147_v30 = vsel %vm1537_vm7, %v144_v23, %v142_v16  ;;  %v146_v32 = vsel %vm1537_vm7, %v142_v16, %v144_v23 }
  0x7c   :  { %808 = vmatprep.subr.msk.mxu0 %vm1067_vm6, %v160_v27  ;;  %vm1541_vm7 = vcmp.lt.s32.totalorder %v1041_v10, 15  ;;  %vm1544_vm5 = vcmp.lt.s32.totalorder %v1041_v10, 16 }
  0x7d   :  { %809 = vmatpush1.msk.msra.mxu0 %vm1076_vm8, %v159_v28 }
  0x7e   :  { %v131_v33 = vpop.permute.xlu1 %130  ;;  %v129_v34 = vpop.permute.xlu0 %128  ;;  %810 = vmatprep.subr.msk.mxu0 %vm1050_vm2, %v147_v30 }
  0x7f   :  { %v133_v36 = vsel %vm1535_vm11, %v129_v34, %v131_v33  ;;  %v134_v37 = vsel %vm1535_vm11, %v131_v33, %v129_v34  ;;  %811 = vmatpush1.msk.msra.mxu0 %vm1058_vm4, %v146_v32  ;;  %vm1141_vm11 = vcmp.ge.s32.totalorder %v37_v12, 1 }
  0x80   :  { %812 = vmatprep.subr.msk.mxu0 %vm1103_vm12, %v134_v37  ;;  %v1581_v44 = vsel %vm1141_vm11, 4294967295, %v1580_v44 }
  0x81   :  { %813 = vmatpush1.msk.msra.mxu0 %vm1115_vm13, %v133_v36 }
  0x82   :  { %v118_v38 = vpop.permute.xlu1 %117  ;;  %v116_v39 = vpop.permute.xlu0 %115 }
  0x83   :  { %v120_v40 = vsel %vm1536_vm14, %v116_v39, %v118_v38  ;;  %v121_v41 = vsel %vm1536_vm14, %v118_v38, %v116_v39  ;;  %vm1151_vm14 = vcmp.ge.s32.totalorder %v36_v14, 1 }
  0x84   :  { %814 = vmatprep.subr.msk.mxu0 %vm1046_vm1, %v121_v41  ;;  %v1583_v47 = vsel %vm1151_vm14, 4294967295, %v1582_v47 }
  0x85   :  { %815 = vmatpush1.msk.msra.mxu0 %vm1054_vm3, %v120_v40 }
  0x86   :  { %v105_v42 = vpop.permute.xlu1 %104  ;;  %v103_v43 = vpop.permute.xlu0 %102  ;;  %816 = vmatprep.subr.msk.mxu0 %vm1539_vm0, %v990_v2 }
  0x87   :  { %v107_v45 = vsel %vm1538_vm15, %v103_v43, %v105_v42  ;;  %v108_v46 = vsel %vm1538_vm15, %v105_v42, %v103_v43  ;;  %817 = vmatpush1.msk.msra.mxu0 %vm1539_vm0, %v984_v0  ;;  %vm1164_vm15 = vmand %vm1141_vm11, %vm1046_vm1 }
  0x88   :  { %818 = vmatprep.subr.msk.mxu0 %vm1080_vm9, %v107_v45  ;;  %vm1172_vm0 = vmand %vm1151_vm14, %vm1054_vm3 }
  0x89   :  { %819 = vmatpush1.msk.msra.mxu0 %vm1088_vm10, %v108_v46  ;;  %v1587_v51 = vsel %vm1172_vm0, 4294967295, %v1586_v51 }
  0x8a   :  { %v92_v49 = vpop.permute.xlu1 %91  ;;  %v90_v50 = vpop.permute.xlu0 %89 }
  0x8b   :  { %v94_v52 = vsel %vm1541_vm7, %v90_v50, %v92_v49  ;;  %v95_v53 = vsel %vm1541_vm7, %v92_v49, %v90_v50  ;;  %vm1549_vm7 = vcmp.lt.s32.totalorder %v1041_v10, 17 }
  0x8c   :  { %820 = vmatprep.subr.msk.mxu0 %vm1164_vm15, %v94_v52 }
  0x8d   :  { %821 = vmatpush1.msk.msra.mxu0 %vm1172_vm0, %v95_v53  ;;  %vm1198_vm0 = vmand %vm1141_vm11, %vm1080_vm9  ;;  %v937_v53 = vmov 0  }
  0x8e   :  { %v79_v54 = vpop.permute.xlu1 %78  ;;  %v77_v55 = vpop.permute.xlu0 %76  ;;  %894 = vset.pattern.permute.xlu1 %v937_v53  ;;  %895 = vset.pattern.permute.xlu0 %v937_v53 }
  0x8f   :  { %v81_v56 = vsel %vm1544_vm5, %v77_v55, %v79_v54  ;;  %v82_v57 = vsel %vm1544_vm5, %v79_v54, %v77_v55  ;;  %vm1206_vm5 = vmand %vm1151_vm14, %vm1088_vm10 }
  0x90   :  { %822 = vmatprep.subr.msk.mxu0 %vm1141_vm11, %v81_v56  ;;  %v1591_v61 = vsel %vm1206_vm5, 4294967295, %v1590_v61  ;;  %vm1552_vm11 = vcmask 588800  }
  0x91   :  { %823 = vmatpush1.msk.msra.mxu0 %vm1151_vm14, %v82_v57  ;;  %vm1592_vm14 = vcmp.lt.s32.totalorder %v1041_v10, 111 }
  0x92   :  { %v66_v59 = vpop.permute.xlu1 %65  ;;  %v64_v60 = vpop.permute.xlu0 %63 }
  0x93   :  { %v68_v62 = vsel %vm1549_vm7, %v64_v60, %v66_v59  ;;  %v69_v63 = vsel %vm1549_vm7, %v66_v59, %v64_v60  ;;  %vm1593_vm7 = vmmov %vm1592_vm14 }
  0x94   :  { %824 = vmatprep.subr.msk.mxu0 %vm1198_vm0, %v68_v62  ;;  %v29_v62 = vld [vmem:[%s1529_s2] sm:$0xff] }
  0x95   :  { %825 = vmatpush1.msk.msra.mxu0 %vm1206_vm5, %v69_v63  ;;  %vm1594_vm5 = vcmp.lt.s32.totalorder %v1041_v10, 112 }
  0x96   :  { %v523_v3 = vpop.permute.xlu1 %522  ;;  %v521_v7 = vpop.permute.xlu0 %520  ;;  %826 = vmatmul.mubr.msk.f32.vlgmr.msra.gmra.mxu0 %vm1552_vm11, %v27_v1  ;;  %vm1595_vm11 = vmmov %vm1594_vm5 }
  0x97   :  { %v524_v8 = vsel %vm1592_vm14, %v521_v7, %v523_v3  ;;  %v525_v9 = vsel %vm1593_vm7, %v523_v3, %v521_v7  ;;  %592 = vmatprep.mubr.f32.mxu0 %v933_v4  ;;  %vm1596_vm7 = vcmp.lt.s32.totalorder %v1041_v10, 113 }
  0x98   :  { %845 = vmatprep.subr.msk.mxu0 %vm1067_vm6, %v525_v9  ;;  %vm1597_vm14 = vmmov %vm1596_vm7 }
  0x99   :  { %846 = vmatpush1.msk.msra.mxu0 %vm1076_vm8, %v524_v8 }
  0x9a   :  { %v515_v11 = vpop.permute.xlu1 %514  ;;  %v513_v12 = vpop.permute.xlu0 %512 }
  0x9b   :  { %v516_v13 = vsel %vm1594_vm5, %v513_v12, %v515_v11  ;;  %v517_v14 = vsel %vm1595_vm11, %v515_v11, %v513_v12  ;;  %vm1598_vm5 = vcmp.lt.s32.totalorder %v1041_v10, 127  ;;  %v30_v11 = vld [vmem:[%s1530_s3] sm:$0xff] }
  0x9c   :  { %847 = vmatprep.subr.msk.mxu0 %vm1050_vm2, %v517_v14  ;;  %vm1599_vm11 = vmmov %vm1598_vm5 }
  0x9d   :  { %848 = vmatpush1.msk.msra.mxu0 %vm1058_vm4, %v516_v13 }
  0x9e   :  { %v507_v15 = vpop.permute.xlu1 %506  ;;  %v505_v16 = vpop.permute.xlu0 %504 }
  0x9f   :  { %v508_v17 = vsel %vm1596_vm7, %v505_v16, %v507_v15  ;;  %v509_v23 = vsel %vm1597_vm14, %v507_v15, %v505_v16  ;;  %vm1600_vm7 = vcmask 1043456   ;;  %vm1601_vm14 = vcmp.lt.s32.totalorder %v1041_v10, 1 }
  0xa0   :  { %849 = vmatprep.subr.msk.mxu0 %vm1103_vm12, %v509_v23 }
  0xa1   :  { %850 = vmatpush1.msk.msra.mxu0 %vm1115_vm13, %v508_v17  ;;  %vm1602_vm13 = vmmov %vm1601_vm14 }
  0xa2   :  { %v499_v24 = vpop.permute.xlu1 %498  ;;  %v497_v27 = vpop.permute.xlu0 %496 }
  0xa3   :  { %v500_v28 = vsel %vm1598_vm5, %v497_v27, %v499_v24  ;;  %v501_v30 = vsel %vm1599_vm11, %v499_v24, %v497_v27  ;;  %vm1603_vm5 = vmmov %vm1600_vm7  ;;  %vm1604_vm11 = vcmp.lt.s32.totalorder %v1041_v10, 15 }
  0xa4   :  { %851 = vmatprep.subr.msk.mxu0 %vm1046_vm1, %v501_v30 }
  0xa5   :  { %852 = vmatpush1.msk.msra.mxu0 %vm1054_vm3, %v500_v28 }
  0xa6   :  { %v491_v32 = vpop.permute.xlu1 %490  ;;  %v489_v33 = vpop.permute.xlu0 %488  ;;  %853 = vmatprep.subr.msk.mxu0 %vm1600_vm7, %v1017_v6  ;;  %vm1605_vm7 = vmmov %vm1604_vm11 }
  0xa7   :  { %v492_v34 = vsel %vm1601_vm14, %v489_v33, %v491_v32  ;;  %v493_v36 = vsel %vm1602_vm13, %v491_v32, %v489_v33  ;;  %854 = vmatpush1.msk.msra.mxu0 %vm1603_vm5, %v1011_v5  ;;  %vm1606_vm13 = vnez %v1587_v51  ;;  %vm1607_vm14 = vcmp.lt.s32.totalorder %v1041_v10, 16 }
  0xa8   :  { %855 = vmatprep.subr.msk.mxu0 %vm1080_vm9, %v492_v34  ;;  %vm1608_vm5 = vmmov %vm1607_vm14 }
  0xa9   :  { %856 = vmatpush1.msk.msra.mxu0 %vm1088_vm10, %v493_v36  ;;  %vm1609_vm10 = vnez %v1581_v44 }
  0xaa   :  { %v483_v37 = vpop.permute.xlu1 %482  ;;  %v481_v38 = vpop.permute.xlu0 %480 }
  0xab   :  { %v484_v39 = vsel %vm1604_vm11, %v481_v38, %v483_v37  ;;  %v485_v40 = vsel %vm1605_vm7, %v483_v37, %v481_v38  ;;  %vm1610_vm11 = vnez %v1583_v47  ;;  %vm1611_vm7 = vcmp.lt.s32.totalorder %v1041_v10, 17 }
  0xac   :  { %857 = vmatprep.subr.msk.mxu0 %vm1164_vm15, %v484_v39 }
  0xad   :  { %858 = vmatpush1.msk.msra.mxu0 %vm1606_vm13, %v485_v40  ;;  %vm1612_vm13 = vmmov %vm1611_vm7 }
  0xae   :  { %v475_v41 = vpop.permute.xlu1 %474  ;;  %v473_v42 = vpop.permute.xlu0 %472 }
  0xaf   :  { %v476_v43 = vsel %vm1607_vm14, %v473_v42, %v475_v41  ;;  %v477_v45 = vsel %vm1608_vm5, %v475_v41, %v473_v42  ;;  %vm1613_vm14 = vnez %v1591_v61  ;;  %vm1614_vm5 = vcmask 588800  }
  0xb0   :  { %859 = vmatprep.subr.msk.mxu0 %vm1609_vm10, %v476_v43 }
  0xb1   :  { %860 = vmatpush1.msk.msra.mxu0 %vm1610_vm11, %v477_v45 }
  0xb2   :  { %v467_v46 = vpop.permute.xlu1 %466  ;;  %v465_v49 = vpop.permute.xlu0 %464 }
  0xb3   :  { %v468_v50 = vsel %vm1611_vm7, %v465_v49, %v467_v46  ;;  %v469_v52 = vsel %vm1612_vm13, %v467_v46, %v465_v49  ;;  %vm1615_vm13 = vcmp.lt.s32.totalorder %v1041_v10, 111 }
  0xb4   :  { %861 = vmatprep.subr.msk.mxu0 %vm1198_vm0, %v468_v50  ;;  %vm1616_vm7 = vmmov %vm1615_vm13 }
  0xb5   :  { %862 = vmatpush1.msk.msra.mxu0 %vm1613_vm14, %v469_v52 }
  0xb6   :  { %863 = vmatmul.mubr.msk.f32.vlgmr.msra.gmra.mxu0 %vm1614_vm5, %v27_v1  ;;  %vm1617_vm5 = vcmp.lt.s32.totalorder %v1041_v10, 112 }
  0xb7   :  { %vm1618_vm14 = vmmov %vm1617_vm5 }
 0x156   :  { %v237_v54 = vpop.f32.mrf.mxu0 }
 0x157   :  { %v245_v55 = vmul.f32 %v237_v54, %v237_v54 }
 0x158   :  { %v239_v56 = vpop.f32.mrf.mxu0 }
 0x159   :  { %v242_v57 = vadd.f32 %v239_v56, %v237_v54  ;;  %v246_v59 = vmul.f32 %v239_v56, %v239_v56 }
 0x15b   :  { %243 = vadd.xlane.f32.xlu0 %v242_v57  ;;  %v247_v60 = vadd.f32 %v246_v59, %v245_v55 }
 0x15d   :  { %248 = vadd.xlane.f32.xlu1 %v247_v60 }
 0x16e   :  { %263 = vperm.xlu1 %894, %v29_v62  }
 0x176   :  { %v594_v63 = vpop.f32.mrf.mxu0 }
 0x177   :  { %v602_v8 = vmul.f32 %v594_v63, %v594_v63 }
 0x178   :  { %v1295_v3 = vpop.f32.mrf.mxu0 }
 0x179   :  { %v603_v1 = vmul.f32 %v1295_v3, %v1295_v3  ;;  %v599_v7 = vadd.f32 %v1295_v3, %v594_v63 }
 0x17b   :  { %600 = vadd.xlane.f32.xlu0 %v599_v7  ;;  %v604_v9 = vadd.f32 %v603_v1, %v602_v8 }
 0x17f   :  { %605 = vadd.xlane.f32.xlu0 %v604_v9 }
 0x195   :  { %270 = vperm.xlu0 %895, %v30_v11  }
 0x1e4   :  { %v244_v12 = vpop.xlane.xlu0 %243 }
 0x1e5   :  { %v250_v13 = vmul.f32 0.00390625, %v244_v12 }
 0x1e6   :  { %v249_v14 = vpop.xlane.xlu1 %248 }
 0x1e7   :  { %v251_v15 = vmul.f32 0.00390625, %v249_v14  ;;  %v252_v16 = vmul.f32 %v250_v13, %v250_v13  ;;  %v257_v33 = vsub.f32 %v237_v54, %v250_v13  ;;  %v258_v37 = vsub.f32 %v239_v56, %v250_v13 }
 0x1e9   :  { %v253_v17 = vsub.f32 %v251_v15, %v252_v16 }
 0x1ea   :  { %v264_v40 = vpop.permute.xlu1 %263 }
 0x1eb   :  { %v254_v23 = vmax.f32 %v253_v17, 0.0 }
 0x1ed   :  { %v255_v24 = vadd.f32 1e-05, %v254_v23 }
 0x1ef   :  { %898 = vrsqrt.f32 %v255_v24 }
 0x1fc   :  { %v899_v30 = vpop.eup %898 }
 0x1fd   :  { %v259_v38 = vmul.f32 %v899_v30, %v257_v33  ;;  %v260_v41 = vmul.f32 %v899_v30, %v258_v37 }
 0x1ff   :  { %v266_v43 = vmul.f32 %v264_v40, %v259_v38  ;;  %v267_v49 = vmul.f32 %v264_v40, %v260_v41 }
 0x204   :  { %v601_v27 = vpop.xlane.xlu0 %600 }
 0x205   :  { %v607_v28 = vmul.f32 0.00390625, %v601_v27 }
 0x207   :  { %v609_v34 = vmul.f32 %v607_v28, %v607_v28  ;;  %v614_v55 = vsub.f32 %v594_v63, %v607_v28  ;;  %v615_v63 = vsub.f32 %v1295_v3, %v607_v28 }
 0x208   :  { %v606_v32 = vpop.xlane.xlu0 %605 }
 0x209   :  { %v608_v36 = vmul.f32 0.00390625, %v606_v32 }
 0x20b   :  { %v610_v39 = vsub.f32 %v608_v36, %v609_v34 }
 0x20d   :  { %v611_v42 = vmax.f32 %v610_v39, 0.0 }
 0x20f   :  { %v612_v45 = vadd.f32 1e-05, %v611_v42 }
 0x210   :  { %v271_v46 = vpop.permute.xlu0 %270 }
 0x211   :  { %900 = vrsqrt.f32 %v612_v45  ;;  %v273_v50 = vadd.f32 %v271_v46, %v266_v43  ;;  %v274_v52 = vadd.f32 %v271_v46, %v267_v49 }
 0x213   :  { %v1303_v53 = vmax.f32 %v273_v50, 0.0  ;;  %v1309_v54 = vmax.f32 %v274_v52, 0.0 }
 0x215   :  { %301 = vrot.lane.b32.xlu0 %v1303_v53, %s932_s30  ;;  %333 = vrot.lane.b32.xlu1 %v1303_v53, %s929_s27 }
 0x219   :  { %293 = vrot.lane.b32.xlu0 %v1303_v53, %s934_s8  ;;  %335 = vrot.lane.b32.xlu1 %v1309_v54, %s929_s27 }
 0x21d   :  { %285 = vrot.lane.b32.xlu0 %v1303_v53, %s935_s11  ;;  %325 = vrot.lane.b32.xlu1 %v1303_v53, %s928_s26 }
 0x21e   :  { %v901_v56 = vpop.eup %900 }
 0x21f   :  { %v616_v57 = vmul.f32 %v901_v56, %v614_v55  ;;  %v617_v1 = vmul.f32 %v901_v56, %v615_v63 }
 0x221   :  { %v618_v59 = vmul.f32 %v616_v57, %v264_v40  ;;  %277 = vrot.lane.b32.xlu0 %v1303_v53, %s936_s12  ;;  %327 = vrot.lane.b32.xlu1 %v1309_v54, %s928_s26  ;;  %v619_v7 = vmul.f32 %v617_v1, %v264_v40 }
 0x223   :  { %v620_v60 = vadd.f32 %v618_v59, %v271_v46  ;;  %v621_v8 = vadd.f32 %v619_v7, %v271_v46  ;;  %v28_v59 = vld [vmem:[%s1531_s4] sm:$0xff] }
 0x225   :  { %v1323_v62 = vmax.f32 %v620_v60, 0.0  ;;  %317 = vrot.lane.b32.xlu1 %v1303_v53, %s930_s28  ;;  %v1356_v3 = vmax.f32 %v621_v8, 0.0 }
 0x227   :  { %680 = vrot.lane.b32.xlu0 %v1323_v62, %s929_s27 }
 0x229   :  { %319 = vrot.lane.b32.xlu1 %v1309_v54, %s930_s28 }
 0x22b   :  { %672 = vrot.lane.b32.xlu0 %v1323_v62, %s928_s26 }
 0x22d   :  { %309 = vrot.lane.b32.xlu1 %v1303_v53, %s931_s29 }
 0x22f   :  { %664 = vrot.lane.b32.xlu0 %v1323_v62, %s930_s28 }
 0x231   :  { %311 = vrot.lane.b32.xlu1 %v1309_v54, %s931_s29 }
 0x233   :  { %656 = vrot.lane.b32.xlu0 %v1323_v62, %s931_s29 }
 0x235   :  { %303 = vrot.lane.b32.xlu1 %v1309_v54, %s932_s30 }
 0x237   :  { %648 = vrot.lane.b32.xlu0 %v1323_v62, %s932_s30 }
 0x239   :  { %295 = vrot.lane.b32.xlu1 %v1309_v54, %s934_s8 }
 0x23b   :  { %640 = vrot.lane.b32.xlu0 %v1323_v62, %s934_s8 }
 0x23d   :  { %287 = vrot.lane.b32.xlu1 %v1309_v54, %s935_s11 }
 0x23f   :  { %632 = vrot.lane.b32.xlu0 %v1323_v62, %s935_s11 }
 0x241   :  { %279 = vrot.lane.b32.xlu1 %v1309_v54, %s936_s12 }
 0x243   :  { %624 = vrot.lane.b32.xlu0 %v1323_v62, %s936_s12 }
 0x245   :  { %682 = vrot.lane.b32.xlu1 %v1356_v3, %s929_s27 }
 0x249   :  { %674 = vrot.lane.b32.xlu1 %v1356_v3, %s928_s26 }
 0x24d   :  { %666 = vrot.lane.b32.xlu1 %v1356_v3, %s930_s28 }
 0x251   :  { %658 = vrot.lane.b32.xlu1 %v1356_v3, %s931_s29 }
 0x255   :  { %650 = vrot.lane.b32.xlu1 %v1356_v3, %s932_s30 }
 0x259   :  { %642 = vrot.lane.b32.xlu1 %v1356_v3, %s934_s8 }
 0x25d   :  { %634 = vrot.lane.b32.xlu1 %v1356_v3, %s935_s11 }
 0x261   :  { %626 = vrot.lane.b32.xlu1 %v1356_v3, %s936_s12 }
 0x287   :  { %v334_v9 = vpop.permute.xlu1 %333  ;;  %v302_v15 = vpop.permute.xlu0 %301 }
 0x28b   :  { %v336_v11 = vpop.permute.xlu1 %335  ;;  %v294_v27 = vpop.permute.xlu0 %293 }
 0x28c   :  { %v338_v12 = vsel %vm1615_vm13, %v336_v11, %v334_v9  ;;  %v337_v13 = vsel %vm1616_vm7, %v334_v9, %v336_v11  ;;  %vm1619_vm13 = vcmp.lt.s32.totalorder %v1041_v10, 113 }
 0x28d   :  { %827 = vmatprep.subr.msk.mxu1 %vm1067_vm6, %v338_v12  ;;  %vm1620_vm7 = vmmov %vm1619_vm13 }
 0x28e   :  { %828 = vmatpush1.msk.msra.mxu1 %vm1076_vm8, %v337_v13 }
 0x28f   :  { %v326_v14 = vpop.permute.xlu1 %325  ;;  %v286_v33 = vpop.permute.xlu0 %285 }
 0x293   :  { %v328_v16 = vpop.permute.xlu1 %327  ;;  %v278_v39 = vpop.permute.xlu0 %277 }
 0x294   :  { %v329_v17 = vsel %vm1617_vm5, %v326_v14, %v328_v16  ;;  %v330_v23 = vsel %vm1618_vm14, %v328_v16, %v326_v14  ;;  %vm1621_vm14 = vnez %v1579_v35  ;;  %vm1622_vm5 = vcmp.lt.s32.totalorder %v1041_v10, 127 }
 0x295   :  { %829 = vmatprep.subr.msk.mxu1 %vm1050_vm2, %v330_v23 }
 0x296   :  { %830 = vmatpush1.msk.msra.mxu1 %vm1058_vm4, %v329_v17  ;;  %vm1623_vm4 = vmmov %vm1622_vm5 }
 0x297   :  { %v318_v24 = vpop.permute.xlu1 %317 }
 0x299   :  { %v681_v43 = vpop.permute.xlu0 %680 }
 0x29b   :  { %v320_v28 = vpop.permute.xlu1 %319 }
 0x29c   :  { %v321_v30 = vsel %vm1619_vm13, %v318_v24, %v320_v28  ;;  %v322_v32 = vsel %vm1620_vm7, %v320_v28, %v318_v24  ;;  %vm1624_vm13 = vcmp.lt.s32.totalorder %v1041_v10, 1 }
 0x29d   :  { %831 = vmatprep.subr.msk.mxu1 %vm1103_vm12, %v322_v32  ;;  %vm1625_vm7 = vmmov %vm1624_vm13  ;;  %v673_v50 = vpop.permute.xlu0 %672 }
 0x29e   :  { %832 = vmatpush1.msk.msra.mxu1 %vm1621_vm14, %v321_v30 }
 0x29f   :  { %v310_v34 = vpop.permute.xlu1 %309 }
 0x2a1   :  { %v665_v60 = vpop.permute.xlu0 %664 }
 0x2a3   :  { %v312_v36 = vpop.permute.xlu1 %311 }
 0x2a4   :  { %v313_v37 = vsel %vm1622_vm5, %v310_v34, %v312_v36  ;;  %v314_v38 = vsel %vm1623_vm4, %v312_v36, %v310_v34  ;;  %vm1626_vm4 = vnez %v1575_v29  ;;  %vm1627_vm5 = vcmp.lt.s32.totalorder %v1041_v10, 15 }
 0x2a5   :  { %833 = vmatprep.subr.msk.mxu1 %vm1046_vm1, %v314_v38  ;;  %v657_v8 = vpop.permute.xlu0 %656  ;;  %v32_v38 = vld [vmem:[%s1533_s6] sm:$0xff] }
 0x2a6   :  { %834 = vmatpush1.msk.msra.mxu1 %vm1054_vm3, %v313_v37  ;;  %vm1628_vm3 = vmmov %vm1627_vm5 }
 0x2a7   :  { %366 = vmatprep.subr.mxu1 %v1309_v54  ;;  %v304_v40 = vpop.permute.xlu1 %303 }
 0x2a8   :  { %v305_v41 = vsel %vm1624_vm13, %v302_v15, %v304_v40  ;;  %v306_v42 = vsel %vm1625_vm7, %v304_v40, %v302_v15  ;;  %367 = vmatpush1.msra.mxu1 %v1303_v53  ;;  %vm1629_vm13 = vnez %v1587_v51  ;;  %vm1630_vm7 = vcmp.lt.s32.totalorder %v1041_v10, 16 }
 0x2a9   :  { %835 = vmatprep.subr.msk.mxu1 %vm1080_vm9, %v305_v41  ;;  %v649_v13 = vpop.permute.xlu0 %648 }
 0x2aa   :  { %836 = vmatpush1.msk.msra.mxu1 %vm1626_vm4, %v306_v42  ;;  %vm1631_vm4 = vmmov %vm1630_vm7 }
 0x2ab   :  { %v296_v45 = vpop.permute.xlu1 %295 }
 0x2ac   :  { %v297_v46 = vsel %vm1627_vm5, %v294_v27, %v296_v45  ;;  %v298_v49 = vsel %vm1628_vm3, %v296_v45, %v294_v27  ;;  %vm1632_vm3 = vcmp.lt.s32.totalorder %v1041_v10, 17 }
 0x2ad   :  { %837 = vmatprep.subr.msk.mxu1 %vm1164_vm15, %v297_v46  ;;  %vm1633_vm5 = vmmov %vm1632_vm3  ;;  %v641_v15 = vpop.permute.xlu0 %640 }
 0x2ae   :  { %838 = vmatpush1.msk.msra.mxu1 %vm1629_vm13, %v298_v49 }
 0x2af   :  { %v288_v52 = vpop.permute.xlu1 %287 }
 0x2b0   :  { %v289_v53 = vsel %vm1630_vm7, %v286_v33, %v288_v52  ;;  %v290_v54 = vsel %vm1631_vm4, %v288_v52, %v286_v33  ;;  %vm1634_vm4 = vnez %v1591_v61  ;;  %vm1635_vm7 = vcmask 588800   ;;  %v31_v61 = vld [vmem:[%s1532_s5] sm:$0xff]  ;;  %s938_s5 = smov [#allocation2]  }
 0x2b1   :  { %839 = vmatprep.subr.msk.mxu1 %vm1609_vm10, %v289_v53  ;;  %v633_v17 = vpop.permute.xlu0 %632  ;;  %s797_s6 = sshll.u32 %s938_s5, 4  ;;  %s798_s6 = int_to_ptr.vmem [resolvable:$true] %s797_s6 }
 0x2b2   :  { %840 = vmatpush1.msk.msra.mxu1 %vm1610_vm11, %v290_v54  ;;  %vm1636_vm11 = vcmp.lt.s32.totalorder %v1041_v10, 111  ;;  %s906_s20 = scalar_lea.vmem %s798_s6, 256  ;;  %p911_p1 = scmp.lt.s32.totalorder %s798_s6, %s798_s6 }
 0x2b3   :  { %v280_v55 = vpop.permute.xlu1 %279  ;;  %p907_p0 = scmp.ne.s32.totalorder %s798_s6, %s906_s20  ;;  %p912_p2 = scmp.lt.s32.totalorder %s906_s20, %s906_s20 }
 0x2b4   :  { %v281_v56 = vsel %vm1632_vm3, %v278_v39, %v280_v55  ;;  %v282_v57 = vsel %vm1633_vm5, %v280_v55, %v278_v39  ;;  %vm1637_vm3 = vmmov %vm1636_vm11  ;;  %vm1638_vm5 = vcmp.lt.s32.totalorder %v1041_v10, 112 }
 0x2b5   :  { %841 = vmatprep.subr.msk.mxu1 %vm1198_vm0, %v281_v56  ;;  %v625_v23 = vpop.permute.xlu0 %624  ;;  %p913_p3 = por %p912_p2, %p911_p1 }
 0x2b6   :  { %842 = vmatpush1.msk.msra.mxu1 %vm1634_vm4, %v282_v57 }
 0x2b7   :  { %843 = vmatmul.mubr.msk.f32.vlgmr.msra.gmra.mxu1 %vm1635_vm7, %v28_v59  ;;  %v683_v63 = vpop.permute.xlu1 %682  ;;  %vm1639_vm7 = vmmov %vm1638_vm5  ;;  %p914_p4 = pnand %p913_p3, %p907_p0 }
 0x2b8   :  { %v684_v1 = vsel %vm1636_vm11, %v681_v43, %v683_v63  ;;  %v685_v7 = vsel %vm1637_vm3, %v683_v63, %v681_v43  ;;  %752 = vmatprep.mubr.f32.mxu1 %v933_v4  ;;  %vm1640_vm11 = vnez %v1567_v21 }
 0x2b9   :  { %864 = vmatprep.subr.msk.mxu1 %vm1067_vm6, %v685_v7  ;;  %vm1641_vm6 = vcmp.lt.s32.totalorder %v1041_v10, 113 }
 0x2ba   :  { %865 = vmatpush1.msk.msra.mxu1 %vm1076_vm8, %v684_v1  ;;  %vm1642_vm8 = vmmov %vm1641_vm6 }
 0x2bb   :  { %v675_v9 = vpop.permute.xlu1 %674 }
 0x2bc   :  { %v676_v11 = vsel %vm1638_vm5, %v673_v50, %v675_v9  ;;  %v677_v12 = vsel %vm1639_vm7, %v675_v9, %v673_v50  ;;  %vm1645_vm5 = vnez %v1565_v20  ;;  %vm1649_vm7 = vcmp.lt.s32.totalorder %v1041_v10, 15 }
 0x2bd   :  { %866 = vmatprep.subr.msk.mxu1 %vm1050_vm2, %v677_v12  ;;  %vm1643_vm2 = vcmp.lt.s32.totalorder %v1041_v10, 127 }
 0x2be   :  { %867 = vmatpush1.msk.msra.mxu1 %vm1640_vm11, %v676_v11  ;;  %vm1644_vm3 = vmmov %vm1643_vm2 }
 0x2bf   :  { %v667_v4 = vpop.permute.xlu1 %666  ;;  %vm1650_vm11 = vmmov %vm1649_vm7 }
 0x2c0   :  { %v668_v22 = vsel %vm1641_vm6, %v665_v60, %v667_v4  ;;  %v669_v25 = vsel %vm1642_vm8, %v667_v4, %v665_v60  ;;  %vm1653_vm8 = vnez %v1583_v47 }
 0x2c1   :  { %868 = vmatprep.subr.msk.mxu1 %vm1103_vm12, %v669_v25  ;;  %vm1646_vm12 = vcmp.lt.s32.totalorder %v1041_v10, 1 }
 0x2c2   :  { %869 = vmatpush1.msk.msra.mxu1 %vm1621_vm14, %v668_v22  ;;  %vm1647_vm14 = vmmov %vm1646_vm12 }
 0x2c3   :  { %v659_v14 = vpop.permute.xlu1 %658 }
 0x2c4   :  { %v660_v19 = vsel %vm1643_vm2, %v657_v8, %v659_v14  ;;  %v661_v21 = vsel %vm1644_vm3, %v659_v14, %v657_v8  ;;  %vm1656_vm2 = vcmask 588800  }
 0x2c5   :  { %870 = vmatprep.subr.msk.mxu1 %vm1046_vm1, %v661_v21  ;;  %vm1648_vm1 = vnez %v1575_v29 }
 0x2c6   :  { %871 = vmatpush1.msk.msra.mxu1 %vm1645_vm5, %v660_v19 }
 0x2c7   :  { %v651_v16 = vpop.permute.xlu1 %650  ;;  %710 = vmatprep.subr.mxu1 %v1356_v3 }
 0x2c8   :  { %v652_v31 = vsel %vm1646_vm12, %v649_v13, %v651_v16  ;;  %v653_v35 = vsel %vm1647_vm14, %v651_v16, %v649_v13  ;;  %711 = vmatpush1.msra.mxu1 %v1323_v62 }
 0x2c9   :  { %872 = vmatprep.subr.msk.mxu1 %vm1080_vm9, %v652_v31  ;;  %vm1651_vm9 = vcmp.lt.s32.totalorder %v1041_v10, 16 }
 0x2ca   :  { %873 = vmatpush1.msk.msra.mxu1 %vm1648_vm1, %v653_v35  ;;  %vm1652_vm6 = vmmov %vm1651_vm9 }
 0x2cb   :  { %v643_v18 = vpop.permute.xlu1 %642 }
 0x2cc   :  { %v644_v20 = vsel %vm1649_vm7, %v641_v15, %v643_v18  ;;  %v645_v3 = vsel %vm1650_vm11, %v643_v18, %v641_v15 }
 0x2cd   :  { %874 = vmatprep.subr.msk.mxu1 %vm1164_vm15, %v644_v20  ;;  %vm1654_vm15 = vcmp.lt.s32.totalorder %v1041_v10, 17 }
 0x2ce   :  { %875 = vmatpush1.msk.msra.mxu1 %vm1629_vm13, %v645_v3  ;;  %vm1655_vm13 = vmmov %vm1654_vm15 }
 0x2cf   :  { %v635_v62 = vpop.permute.xlu1 %634 }
 0x2d0   :  { %v636_v26 = vsel %vm1651_vm9, %v633_v17, %v635_v62  ;;  %v637_v29 = vsel %vm1652_vm6, %v635_v62, %v633_v17 }
 0x2d1   :  { %876 = vmatprep.subr.msk.mxu1 %vm1609_vm10, %v636_v26 }
 0x2d2   :  { %877 = vmatpush1.msk.msra.mxu1 %vm1653_vm8, %v637_v29 }
 0x2d3   :  { %v627_v24 = vpop.permute.xlu1 %626 }
 0x2d4   :  { %v628_v48 = vsel %vm1654_vm15, %v625_v23, %v627_v24  ;;  %v629_v51 = vsel %vm1655_vm13, %v627_v24, %v625_v23 }
 0x2d5   :  { %878 = vmatprep.subr.msk.mxu1 %vm1198_vm0, %v628_v48 }
 0x2d6   :  { %879 = vmatpush1.msk.msra.mxu1 %vm1634_vm4, %v629_v51 }
 0x2d7   :  { %880 = vmatmul.mubr.msk.f32.vlgmr.msra.gmra.mxu1 %vm1656_vm2, %v28_v59 }
 0x377   :  { %v410_v44 = vpop.f32.mrf.mxu1 }
 0x378   :  { %v418_v27 = vmul.f32 %v410_v44, %v410_v44 }
 0x379   :  { %v412_v47 = vpop.f32.mrf.mxu1 }
 0x37a   :  { %v415_v28 = vadd.f32 %v412_v47, %v410_v44  ;;  %v419_v30 = vmul.f32 %v412_v47, %v412_v47 }
 0x37c   :  { %416 = vadd.xlane.f32.xlu0 %v415_v28  ;;  %v420_v32 = vadd.f32 %v419_v30, %v418_v27 }
 0x380   :  { %421 = vadd.xlane.f32.xlu0 %v420_v32 }
 0x397   :  { %v754_v33 = vpop.f32.mrf.mxu1 }
 0x398   :  { %v762_v37 = vmul.f32 %v754_v33, %v754_v33 }
 0x399   :  { %v756_v34 = vpop.f32.mrf.mxu1 }
 0x39a   :  { %v763_v10 = vmul.f32 %v756_v34, %v756_v34  ;;  %v759_v36 = vadd.f32 %v756_v34, %v754_v33 }
 0x39c   :  { %760 = vadd.xlane.f32.xlu1 %v759_v36  ;;  %v764_v58 = vadd.f32 %v763_v10, %v762_v37 }
 0x39e   :  { %765 = vadd.xlane.f32.xlu0 %v764_v58 }
 0x3ad   :  { %436 = vperm.xlu1 %894, %v31_v61  }
 0x3b4   :  { %443 = vperm.xlu0 %895, %v32_v38  }
 0x405   :  { %v417_v39 = vpop.xlane.xlu0 %416 }
 0x406   :  { %v423_v41 = vmul.f32 0.00390625, %v417_v39 }
 0x408   :  { %v425_v42 = vmul.f32 %v423_v41, %v423_v41  ;;  %v430_v57 = vsub.f32 %v410_v44, %v423_v41  ;;  %v431_v59 = vsub.f32 %v412_v47, %v423_v41 }
 0x409   :  { %v422_v40 = vpop.xlane.xlu0 %421 }
 0x40a   :  { %v424_v43 = vmul.f32 0.00390625, %v422_v40 }
 0x40c   :  { %v426_v45 = vsub.f32 %v424_v43, %v425_v42 }
 0x40e   :  { %v427_v46 = vmax.f32 %v426_v45, 0.0 }
 0x410   :  { %v428_v49 = vadd.f32 1e-05, %v427_v46 }
 0x412   :  { %902 = vrsqrt.f32 %v428_v49 }
 0x41f   :  { %v903_v56 = vpop.eup %902 }
 0x420   :  { %v432_v7 = vmul.f32 %v903_v56, %v430_v57  ;;  %v433_v8 = vmul.f32 %v903_v56, %v431_v59 }
 0x425   :  { %v761_v50 = vpop.xlane.xlu1 %760 }
 0x426   :  { %v767_v52 = vmul.f32 0.00390625, %v761_v50 }
 0x427   :  { %v766_v53 = vpop.xlane.xlu0 %765 }
 0x428   :  { %v769_v54 = vmul.f32 %v767_v52, %v767_v52  ;;  %v768_v55 = vmul.f32 0.00390625, %v766_v53  ;;  %v774_v16 = vsub.f32 %v754_v33, %v767_v52  ;;  %v775_v31 = vsub.f32 %v756_v34, %v767_v52 }
 0x429   :  { %v437_v63 = vpop.permute.xlu1 %436 }
 0x42a   :  { %v770_v60 = vsub.f32 %v768_v55, %v769_v54  ;;  %v439_v11 = vmul.f32 %v437_v63, %v432_v7  ;;  %v440_v12 = vmul.f32 %v437_v63, %v433_v8 }
 0x42c   :  { %v771_v1 = vmax.f32 %v770_v60, 0.0 }
 0x42e   :  { %v772_v9 = vadd.f32 1e-05, %v771_v1 }
 0x42f   :  { %v444_v4 = vpop.permute.xlu0 %443 }
 0x430   :  { %904 = vrsqrt.f32 %v772_v9  ;;  %v446_v22 = vadd.f32 %v444_v4, %v439_v11  ;;  %v447_v25 = vadd.f32 %v444_v4, %v440_v12 }
 0x432   :  { %v448_v13 = vmax.f32 %v446_v22, 0.0  ;;  %v449_v14 = vmax.f32 %v447_v25, 0.0 }
 0x434   :  { %v450_v19 = vadd.f32 %v448_v13, %v984_v0  ;;  %v451_v21 = vadd.f32 %v449_v14, %v990_v2 }
 0x436   :  { %v454_v15 = vcombine.low %v450_v19, %v451_v21 }
 0x438   :  { %456 = vst [vmem:[#allocation2] sm:$0xff] %v454_v15 }
 0x43d   :  { %v905_v35 = vpop.eup %904 }
 0x43e   :  { %v776_v18 = vmul.f32 %v905_v35, %v774_v16  ;;  %v777_v20 = vmul.f32 %v905_v35, %v775_v31 }
 0x440   :  { %v778_v3 = vmul.f32 %v776_v18, %v437_v63  ;;  %v779_v17 = vmul.f32 %v777_v20, %v437_v63 }
 0x442   :  { %v780_v62 = vadd.f32 %v778_v3, %v444_v4  ;;  %v781_v26 = vadd.f32 %v779_v17, %v444_v4 }
 0x444   :  { %v782_v29 = vmax.f32 %v780_v62, 0.0  ;;  %v783_v23 = vmax.f32 %v781_v26, 0.0 }
 0x446   :  { %v784_v24 = vadd.f32 %v1011_v5, %v782_v29  ;;  %v785_v0 = vadd.f32 %v783_v23, %v1017_v6 }
 0x448   :  { %v788_v2 = vcombine.low %v784_v24, %v785_v0 }
 0x44a   :  { %791 = vst [vmem:[#allocation2 + $0x8] sm:$0xff] %v788_v2 }
 0x44b   :  { %917 = shalt.err (!%p914_p4)
}
 0x44c   :  { %s939_s21 = smov 128   ;;  %s940_s22 = smov 8  }
 0x44d   :  { %803 = dma.vmem_to_hbm [thread:$0]  %s798_s6, 256, %s1534_s7, [#allocation3], %s939_s21, %s939_s21, %s940_s22  }
 0x44e   :  { %926 = dma.done.wait [#allocation3], 256  }
 0x44f   :  { %927 = vsyncadd [#allocation3], 4294967040 }
 0x450   :  { %807 = vsyncpa [#allocation3], 1 }

</bundles_post_ra>
